<compile_context>
chip_gen: v7x
topology: tpu7x:2x2x1
jax: 0.10.0
libtpu: 0.0.40
codegen_flags: <defaults>
</compile_context>

<pallas_src>
import functools
import math

import jax
import jax.numpy as jnp
from jax import lax
from jax.experimental import pallas as pl
from jax.experimental.pallas import tpu as pltpu


_CHANNELS = [19, 64, 32, 16, 4, 16, 32, 64, 19]
_ACTS = ("relu",) * 7 + ("sigmoid",)


def _fused_autoencoder_kernel(x_ref, *refs, L, acts, mm_dtype):
    """Fused 8-layer Conv1d(k=3, 'same') autoencoder, channels-on-sublanes.

    x_ref : (C_in, M)  M = batch_tile * L columns (time-major, multiple of L and 128)
    refs  : w0, b0, ..., w7, b7, o_ref
            w_i : (3, C_out_i, C_in_i)   tap 0 = left neighbour, 1 = center, 2 = right
            b_i : (C_out_i, 1)
    o_ref : (C_out_last, M)
    """
    o_ref = refs[-1]
    param_refs = refs[:-1]
    M = x_ref.shape[1]

    # Per-sequence boundary masks, built once per grid step from one (1, M) iota.
    # Column t has a left neighbour iff t % L != 0, a right one iff t % L != L-1.
    t = lax.broadcasted_iota(jnp.int32, (1, M), 1)
    not_start = (t % L) != 0
    not_end = (t % L) != (L - 1)

    h = x_ref[...].astype(jnp.float32)
    for i, act in enumerate(acts):
        w_ref = param_refs[2 * i]        # (3, C_out, C_in)
        b_ref = param_refs[2 * i + 1]    # (C_out, 1)

        # 'same' zero padding via lane rolls (XLU) + boundary select (VPU).
        # Roll wrap-around lands only on masked (sequence-boundary) columns
        # because M is a multiple of L.
        prev = jnp.where(not_start, pltpu.roll(h, shift=1, axis=1), 0.0)
        nxt = jnp.where(not_end, pltpu.roll(h, shift=M - 1, axis=1), 0.0)

        acc = jnp.dot(w_ref[0].astype(mm_dtype), prev.astype(mm_dtype),
                      preferred_element_type=jnp.float32)
        acc = acc + jnp.dot(w_ref[1].astype(mm_dtype), h.astype(mm_dtype),
                            preferred_element_type=jnp.float32)
        acc = acc + jnp.dot(w_ref[2].astype(mm_dtype), nxt.astype(mm_dtype),
                            preferred_element_type=jnp.float32)
        acc = acc + b_ref[...]
        h = jnp.maximum(acc, 0.0) if act == "relu" else jax.nn.sigmoid(acc)

    o_ref[...] = h.astype(o_ref.dtype)


def _pick_tiling(total_cols, L, target_cols=512):
    """Block width (columns per grid step), padded total, number of tiles.

    Width is a multiple of lcm(L, 128): multiple of L so no sequence straddles
    a block boundary, multiple of 128 so lane rolls / stores stay aligned and
    lane-dense.  Width aims at ~512 columns to amortize per-step overhead, but
    prefers >= 2 grid steps when the problem allows (v7x dual TensorCore)."""
    base = (L * 128) // math.gcd(L, 128)          # lcm(L, 128)
    n_base = -(-total_cols // base)                # ceil
    k_target = max(1, target_cols // base)
    k_split = max(1, n_base // 2)
    k = min(k_target, k_split)
    width = base * k
    padded = -(-total_cols // width) * width
    return width, padded, padded // width


def conv1d_autoencoder_forward(params, x, *, matmul_dtype=jnp.float32):
    """x: (B, L, C_in) float32 -> (B, L, C_in).

    Equivalent to Conv1DAutoencoder.forward on an input of shape (B, L, C):
    the permute(0, 2, 1) pairs in the PyTorch module are layout-only and are
    absorbed into the wrapper's layout transform.
    """
    assert len(params) == len(_ACTS)
    B, L, C_in = x.shape
    C_out = params[-1][0].shape[0]

    total = B * L
    width, padded, n_tiles = _pick_tiling(total, L)

    # Channels-on-sublanes / time-on-lanes layout: (C, B*L), column = b*L + t.
    x2 = jnp.transpose(x, (2, 0, 1)).reshape(C_in, total)
    if padded > total:
        x2 = jnp.pad(x2, ((0, 0), (0, padded - total)))

    flat_params = []
    in_specs = [pl.BlockSpec((C_in, width), lambda i: (0, i))]
    for (w, b) in params:
        # PyTorch Conv1d weight layout is (C_out, C_in, K); kernel wants (K, C_out, C_in).
        wk = jnp.transpose(w, (2, 0, 1))
        bk = b.reshape(-1, 1)
        flat_params += [wk, bk]
        # Grid-invariant weight/bias blocks (constant index_map => VMEM-resident).
        in_specs.append(pl.BlockSpec(wk.shape, lambda i: (0, 0, 0)))
        in_specs.append(pl.BlockSpec(bk.shape, lambda i: (0, 0)))

    kernel = functools.partial(_fused_autoencoder_kernel, L=L, acts=_ACTS,
                               mm_dtype=matmul_dtype)
    out2 = pl.pallas_call(
        kernel,
        out_shape=jax.ShapeDtypeStruct((C_out, padded), x.dtype),
        grid=(n_tiles,),
        in_specs=in_specs,
        out_specs=pl.BlockSpec((C_out, width), lambda i: (0, i)),
        compiler_params=pltpu.CompilerParams(
            dimension_semantics=("parallel",)),
    )(x2, *flat_params)

    out = out2[:, :total].reshape(C_out, B, L)
    return jnp.transpose(out, (1, 2, 0))


# ---- parameter construction (deterministic, synthetic) ----------------------

def init_params(key, input_channels=19):
    chans = list(_CHANNELS)
    chans[0] = input_channels
    chans[-1] = input_channels
    params = []
    for i in range(len(chans) - 1):
        c_in, c_out = chans[i], chans[i + 1]
        key, kw, kb = jax.random.split(key, 3)
        scale = 1.0 / jnp.sqrt(jnp.float32(c_in * 3))
        # PyTorch Conv1d layout: weight (C_out, C_in, K), bias (C_out,)
        w = jax.random.uniform(kw, (c_out, c_in, 3), jnp.float32, -scale, scale)
        b = jax.random.uniform(kb, (c_out,), jnp.float32, -scale, scale)
        params.append((w, b))
    return params


# ---- pure-JAX reference for correctness check --------------------------------

def _ref_forward(params, x):
    h = jnp.transpose(x, (0, 2, 1))  # (B, C, L) like PyTorch
    for (w, b), act in zip(params, _ACTS):
        h = lax.conv_general_dilated(
            h, w, window_strides=(1,), padding="SAME",
            dimension_numbers=("NCH", "OIH", "NCH"))
        h = h + b[None, :, None]
        h = jnp.maximum(h, 0.0) if act == "relu" else jax.nn.sigmoid(h)
    return jnp.transpose(h, (0, 2, 1))


if __name__ == "__main__":
    key = jax.random.PRNGKey(0)
    key, kx = jax.random.split(key)

    B, L, C = 2, 16, 19  # batch, sequence length, input_channels
    x = jax.random.uniform(kx, (B, L, C), jnp.float32)
    params = init_params(key, input_channels=C)

    out = jax.block_until_ready(conv1d_autoencoder_forward(params, x))
    ref = _ref_forward(params, x)

    assert out.shape == (B, L, C), out.shape
    # f32 MXU matmuls are pass-decomposed; tolerance allows accumulation-order
    # differences vs. the XLA conv reference across the 8 layers.
    assert jnp.allclose(out, ref, atol=1e-4, rtol=1e-4), (
        float(jnp.max(jnp.abs(out - ref))))
    print("KERNEL_OK")
</pallas_src>

<mosaic_0001>
module attributes {stable_mosaic.version = 11 : i64} {
  func.func @_fused_autoencoder_kernel(%arg0: i32, %arg1: memref<19x128xf32, #tpu.memory_space<vmem>>, %arg2: memref<3x64x19xf32, #tpu.memory_space<vmem>>, %arg3: memref<64x1xf32, #tpu.memory_space<vmem>>, %arg4: memref<3x32x64xf32, #tpu.memory_space<vmem>>, %arg5: memref<32x1xf32, #tpu.memory_space<vmem>>, %arg6: memref<3x16x32xf32, #tpu.memory_space<vmem>>, %arg7: memref<16x1xf32, #tpu.memory_space<vmem>>, %arg8: memref<3x4x16xf32, #tpu.memory_space<vmem>>, %arg9: memref<4x1xf32, #tpu.memory_space<vmem>>, %arg10: memref<3x16x4xf32, #tpu.memory_space<vmem>>, %arg11: memref<16x1xf32, #tpu.memory_space<vmem>>, %arg12: memref<3x32x16xf32, #tpu.memory_space<vmem>>, %arg13: memref<32x1xf32, #tpu.memory_space<vmem>>, %arg14: memref<3x64x32xf32, #tpu.memory_space<vmem>>, %arg15: memref<64x1xf32, #tpu.memory_space<vmem>>, %arg16: memref<3x19x64xf32, #tpu.memory_space<vmem>>, %arg17: memref<19x1xf32, #tpu.memory_space<vmem>>, %arg18: memref<19x128xf32, #tpu.memory_space<vmem>>) attributes {dimension_semantics = [#tpu.dimension_semantics<parallel>], iteration_bounds = array<i64: 1>, scalar_prefetch = 0 : i64, scratch_operands = 0 : i64, tpu.core_type = #tpu.core_type<tc>, window_params = [{transform_indices = @transform_0, window_bounds = array<i64: 19, 128>}, {pipeline_mode = #tpu.pipeline_mode<synchronous>, transform_indices = @transform_1, window_bounds = array<i64: 3, 64, 19>}, {pipeline_mode = #tpu.pipeline_mode<synchronous>, transform_indices = @transform_2, window_bounds = array<i64: 64, 1>}, {pipeline_mode = #tpu.pipeline_mode<synchronous>, transform_indices = @transform_3, window_bounds = array<i64: 3, 32, 64>}, {pipeline_mode = #tpu.pipeline_mode<synchronous>, transform_indices = @transform_4, window_bounds = array<i64: 32, 1>}, {pipeline_mode = #tpu.pipeline_mode<synchronous>, transform_indices = @transform_5, window_bounds = array<i64: 3, 16, 32>}, {pipeline_mode = #tpu.pipeline_mode<synchronous>, transform_indices = @transform_6, window_bounds = array<i64: 16, 1>}, {pipeline_mode = #tpu.pipeline_mode<synchronous>, transform_indices = @transform_7, window_bounds = array<i64: 3, 4, 16>}, {pipeline_mode = #tpu.pipeline_mode<synchronous>, transform_indices = @transform_8, window_bounds = array<i64: 4, 1>}, {pipeline_mode = #tpu.pipeline_mode<synchronous>, transform_indices = @transform_9, window_bounds = array<i64: 3, 16, 4>}, {pipeline_mode = #tpu.pipeline_mode<synchronous>, transform_indices = @transform_10, window_bounds = array<i64: 16, 1>}, {pipeline_mode = #tpu.pipeline_mode<synchronous>, transform_indices = @transform_11, window_bounds = array<i64: 3, 32, 16>}, {pipeline_mode = #tpu.pipeline_mode<synchronous>, transform_indices = @transform_12, window_bounds = array<i64: 32, 1>}, {pipeline_mode = #tpu.pipeline_mode<synchronous>, transform_indices = @transform_13, window_bounds = array<i64: 3, 64, 32>}, {pipeline_mode = #tpu.pipeline_mode<synchronous>, transform_indices = @transform_14, window_bounds = array<i64: 64, 1>}, {pipeline_mode = #tpu.pipeline_mode<synchronous>, transform_indices = @transform_15, window_bounds = array<i64: 3, 19, 64>}, {pipeline_mode = #tpu.pipeline_mode<synchronous>, transform_indices = @transform_16, window_bounds = array<i64: 19, 1>}, {transform_indices = @transform_17, window_bounds = array<i64: 19, 128>}]} {
    %0 = tpu.iota {dimensions = array<i32: 1>} : vector<1x128xi32>
    %c16_i32 = arith.constant 16 : i32
    %c0_i32 = arith.constant 0 : i32
    %1 = arith.cmpi eq, %c16_i32, %c0_i32 : i32
    %c1_i32 = arith.constant 1 : i32
    %2 = arith.select %1, %c1_i32, %c16_i32 : i32
    %3 = vector.broadcast %2 : i32 to vector<1x128xi32>
    %4 = arith.remsi %0, %3 : vector<1x128xi32>
    %c0_i32_0 = arith.constant 0 : i32
    %5 = vector.broadcast %c0_i32_0 : i32 to vector<1x128xi32>
    %6 = arith.cmpi ne, %4, %5 : vector<1x128xi32>
    %c0_i32_1 = arith.constant 0 : i32
    %7 = vector.broadcast %c0_i32_1 : i32 to vector<1x128xi32>
    %8 = arith.cmpi slt, %4, %7 : vector<1x128xi32>
    %c0_i32_2 = arith.constant 0 : i32
    %9 = arith.cmpi slt, %2, %c0_i32_2 : i32
    %10 = vector.broadcast %9 : i1 to vector<1x128xi1>
    %11 = vector.broadcast %10 : vector<1x128xi1> to vector<1x128xi1>
    %12 = arith.xori %8, %11 : vector<1x128xi1>
    %13 = arith.andi %12, %6 : vector<1x128xi1>
    %14 = vector.broadcast %2 : i32 to vector<1x128xi32>
    %15 = arith.addi %4, %14 : vector<1x128xi32>
    %16 = arith.select %13, %15, %4 : vector<1x128xi1>, vector<1x128xi32>
    %c0_i32_3 = arith.constant 0 : i32
    %17 = vector.broadcast %c0_i32_3 : i32 to vector<1x128xi32>
    %18 = arith.cmpi ne, %16, %17 : vector<1x128xi32>
    %c16_i32_4 = arith.constant 16 : i32
    %c0_i32_5 = arith.constant 0 : i32
    %19 = arith.cmpi eq, %c16_i32_4, %c0_i32_5 : i32
    %c1_i32_6 = arith.constant 1 : i32
    %20 = arith.select %19, %c1_i32_6, %c16_i32_4 : i32
    %21 = vector.broadcast %20 : i32 to vector<1x128xi32>
    %22 = arith.remsi %0, %21 : vector<1x128xi32>
    %c0_i32_7 = arith.constant 0 : i32
    %23 = vector.broadcast %c0_i32_7 : i32 to vector<1x128xi32>
    %24 = arith.cmpi ne, %22, %23 : vector<1x128xi32>
    %c0_i32_8 = arith.constant 0 : i32
    %25 = vector.broadcast %c0_i32_8 : i32 to vector<1x128xi32>
    %26 = arith.cmpi slt, %22, %25 : vector<1x128xi32>
    %c0_i32_9 = arith.constant 0 : i32
    %27 = arith.cmpi slt, %20, %c0_i32_9 : i32
    %28 = vector.broadcast %27 : i1 to vector<1x128xi1>
    %29 = vector.broadcast %28 : vector<1x128xi1> to vector<1x128xi1>
    %30 = arith.xori %26, %29 : vector<1x128xi1>
    %31 = arith.andi %30, %24 : vector<1x128xi1>
    %32 = vector.broadcast %20 : i32 to vector<1x128xi32>
    %33 = arith.addi %22, %32 : vector<1x128xi32>
    %34 = arith.select %31, %33, %22 : vector<1x128xi1>, vector<1x128xi32>
    %c15_i32 = arith.constant 15 : i32
    %35 = vector.broadcast %c15_i32 : i32 to vector<1x128xi32>
    %36 = arith.cmpi ne, %34, %35 : vector<1x128xi32>
    %c0 = arith.constant 0 : index
    %c0_10 = arith.constant 0 : index
    %37 = vector.load %arg1[%c0, %c0_10] : memref<19x128xf32, #tpu.memory_space<vmem>>, vector<19x128xf32>
    %c1_i32_11 = arith.constant 1 : i32
    %38 = tpu.dynamic_rotate %37 by %c1_i32_11 dim 1 : vector<19x128xf32>, i32 -> vector<19x128xf32>
    %cst = arith.constant 0.000000e+00 : f32
    %39 = vector.shape_cast %18 : vector<1x128xi1> to vector<1x128xi1>
    %40 = vector.broadcast %39 : vector<1x128xi1> to vector<19x128xi1>
    %41 = vector.broadcast %cst : f32 to vector<19x128xf32>
    %42 = arith.select %40, %38, %41 : vector<19x128xi1>, vector<19x128xf32>
    %c127_i32 = arith.constant 127 : i32
    %43 = tpu.dynamic_rotate %37 by %c127_i32 dim 1 : vector<19x128xf32>, i32 -> vector<19x128xf32>
    %cst_12 = arith.constant 0.000000e+00 : f32
    %44 = vector.shape_cast %36 : vector<1x128xi1> to vector<1x128xi1>
    %45 = vector.broadcast %44 : vector<1x128xi1> to vector<19x128xi1>
    %46 = vector.broadcast %cst_12 : f32 to vector<19x128xf32>
    %47 = arith.select %45, %43, %46 : vector<19x128xi1>, vector<19x128xf32>
    %c0_13 = arith.constant 0 : index
    %c0_14 = arith.constant 0 : index
    %c0_15 = arith.constant 0 : index
    %48 = vector.load %arg2[%c0_13, %c0_14, %c0_15] : memref<3x64x19xf32, #tpu.memory_space<vmem>>, vector<1x64x19xf32>
    %49 = vector.shape_cast %48 : vector<1x64x19xf32> to vector<64x19xf32>
    %cst_16 = arith.constant dense<0.000000e+00> : vector<64x128xf32>
    %50 = tpu.matmul %49, %42, %cst_16 {dimension_numbers = #tpu.dot_dimension_numbers<[1], [0], [0], [1], [0, 0, 1, 1], [], []>} : vector<64x19xf32>, vector<19x128xf32>, vector<64x128xf32> -> vector<64x128xf32>
    %c1 = arith.constant 1 : index
    %c0_17 = arith.constant 0 : index
    %c0_18 = arith.constant 0 : index
    %51 = vector.load %arg2[%c1, %c0_17, %c0_18] : memref<3x64x19xf32, #tpu.memory_space<vmem>>, vector<1x64x19xf32>
    %52 = vector.shape_cast %51 : vector<1x64x19xf32> to vector<64x19xf32>
    %cst_19 = arith.constant dense<0.000000e+00> : vector<64x128xf32>
    %53 = tpu.matmul %52, %37, %cst_19 {dimension_numbers = #tpu.dot_dimension_numbers<[1], [0], [0], [1], [0, 0, 1, 1], [], []>} : vector<64x19xf32>, vector<19x128xf32>, vector<64x128xf32> -> vector<64x128xf32>
    %54 = arith.addf %50, %53 : vector<64x128xf32>
    %c2 = arith.constant 2 : index
    %c0_20 = arith.constant 0 : index
    %c0_21 = arith.constant 0 : index
    %55 = vector.load %arg2[%c2, %c0_20, %c0_21] : memref<3x64x19xf32, #tpu.memory_space<vmem>>, vector<1x64x19xf32>
    %56 = vector.shape_cast %55 : vector<1x64x19xf32> to vector<64x19xf32>
    %cst_22 = arith.constant dense<0.000000e+00> : vector<64x128xf32>
    %57 = tpu.matmul %56, %47, %cst_22 {dimension_numbers = #tpu.dot_dimension_numbers<[1], [0], [0], [1], [0, 0, 1, 1], [], []>} : vector<64x19xf32>, vector<19x128xf32>, vector<64x128xf32> -> vector<64x128xf32>
    %58 = arith.addf %54, %57 : vector<64x128xf32>
    %c0_23 = arith.constant 0 : index
    %c0_24 = arith.constant 0 : index
    %59 = vector.load %arg3[%c0_23, %c0_24] : memref<64x1xf32, #tpu.memory_space<vmem>>, vector<64x1xf32>
    %60 = vector.broadcast %59 : vector<64x1xf32> to vector<64x128xf32>
    %61 = arith.addf %58, %60 : vector<64x128xf32>
    %cst_25 = arith.constant 0.000000e+00 : f32
    %62 = vector.broadcast %cst_25 : f32 to vector<64x128xf32>
    %63 = arith.maximumf %61, %62 : vector<64x128xf32>
    %c1_i32_26 = arith.constant 1 : i32
    %64 = tpu.dynamic_rotate %63 by %c1_i32_26 dim 1 : vector<64x128xf32>, i32 -> vector<64x128xf32>
    %cst_27 = arith.constant 0.000000e+00 : f32
    %65 = vector.shape_cast %18 : vector<1x128xi1> to vector<1x128xi1>
    %66 = vector.broadcast %65 : vector<1x128xi1> to vector<64x128xi1>
    %67 = vector.broadcast %cst_27 : f32 to vector<64x128xf32>
    %68 = arith.select %66, %64, %67 : vector<64x128xi1>, vector<64x128xf32>
    %c127_i32_28 = arith.constant 127 : i32
    %69 = tpu.dynamic_rotate %63 by %c127_i32_28 dim 1 : vector<64x128xf32>, i32 -> vector<64x128xf32>
    %cst_29 = arith.constant 0.000000e+00 : f32
    %70 = vector.shape_cast %36 : vector<1x128xi1> to vector<1x128xi1>
    %71 = vector.broadcast %70 : vector<1x128xi1> to vector<64x128xi1>
    %72 = vector.broadcast %cst_29 : f32 to vector<64x128xf32>
    %73 = arith.select %71, %69, %72 : vector<64x128xi1>, vector<64x128xf32>
    %c0_30 = arith.constant 0 : index
    %c0_31 = arith.constant 0 : index
    %c0_32 = arith.constant 0 : index
    %74 = vector.load %arg4[%c0_30, %c0_31, %c0_32] : memref<3x32x64xf32, #tpu.memory_space<vmem>>, vector<1x32x64xf32>
    %75 = vector.shape_cast %74 : vector<1x32x64xf32> to vector<32x64xf32>
    %cst_33 = arith.constant dense<0.000000e+00> : vector<32x128xf32>
    %76 = tpu.matmul %75, %68, %cst_33 {dimension_numbers = #tpu.dot_dimension_numbers<[1], [0], [0], [1], [0, 0, 1, 1], [], []>} : vector<32x64xf32>, vector<64x128xf32>, vector<32x128xf32> -> vector<32x128xf32>
    %c1_34 = arith.constant 1 : index
    %c0_35 = arith.constant 0 : index
    %c0_36 = arith.constant 0 : index
    %77 = vector.load %arg4[%c1_34, %c0_35, %c0_36] : memref<3x32x64xf32, #tpu.memory_space<vmem>>, vector<1x32x64xf32>
    %78 = vector.shape_cast %77 : vector<1x32x64xf32> to vector<32x64xf32>
    %cst_37 = arith.constant dense<0.000000e+00> : vector<32x128xf32>
    %79 = tpu.matmul %78, %63, %cst_37 {dimension_numbers = #tpu.dot_dimension_numbers<[1], [0], [0], [1], [0, 0, 1, 1], [], []>} : vector<32x64xf32>, vector<64x128xf32>, vector<32x128xf32> -> vector<32x128xf32>
    %80 = arith.addf %76, %79 : vector<32x128xf32>
    %c2_38 = arith.constant 2 : index
    %c0_39 = arith.constant 0 : index
    %c0_40 = arith.constant 0 : index
    %81 = vector.load %arg4[%c2_38, %c0_39, %c0_40] : memref<3x32x64xf32, #tpu.memory_space<vmem>>, vector<1x32x64xf32>
    %82 = vector.shape_cast %81 : vector<1x32x64xf32> to vector<32x64xf32>
    %cst_41 = arith.constant dense<0.000000e+00> : vector<32x128xf32>
    %83 = tpu.matmul %82, %73, %cst_41 {dimension_numbers = #tpu.dot_dimension_numbers<[1], [0], [0], [1], [0, 0, 1, 1], [], []>} : vector<32x64xf32>, vector<64x128xf32>, vector<32x128xf32> -> vector<32x128xf32>
    %84 = arith.addf %80, %83 : vector<32x128xf32>
    %c0_42 = arith.constant 0 : index
    %c0_43 = arith.constant 0 : index
    %85 = vector.load %arg5[%c0_42, %c0_43] : memref<32x1xf32, #tpu.memory_space<vmem>>, vector<32x1xf32>
    %86 = vector.broadcast %85 : vector<32x1xf32> to vector<32x128xf32>
    %87 = arith.addf %84, %86 : vector<32x128xf32>
    %cst_44 = arith.constant 0.000000e+00 : f32
    %88 = vector.broadcast %cst_44 : f32 to vector<32x128xf32>
    %89 = arith.maximumf %87, %88 : vector<32x128xf32>
    %c1_i32_45 = arith.constant 1 : i32
    %90 = tpu.dynamic_rotate %89 by %c1_i32_45 dim 1 : vector<32x128xf32>, i32 -> vector<32x128xf32>
    %cst_46 = arith.constant 0.000000e+00 : f32
    %91 = vector.shape_cast %18 : vector<1x128xi1> to vector<1x128xi1>
    %92 = vector.broadcast %91 : vector<1x128xi1> to vector<32x128xi1>
    %93 = vector.broadcast %cst_46 : f32 to vector<32x128xf32>
    %94 = arith.select %92, %90, %93 : vector<32x128xi1>, vector<32x128xf32>
    %c127_i32_47 = arith.constant 127 : i32
    %95 = tpu.dynamic_rotate %89 by %c127_i32_47 dim 1 : vector<32x128xf32>, i32 -> vector<32x128xf32>
    %cst_48 = arith.constant 0.000000e+00 : f32
    %96 = vector.shape_cast %36 : vector<1x128xi1> to vector<1x128xi1>
    %97 = vector.broadcast %96 : vector<1x128xi1> to vector<32x128xi1>
    %98 = vector.broadcast %cst_48 : f32 to vector<32x128xf32>
    %99 = arith.select %97, %95, %98 : vector<32x128xi1>, vector<32x128xf32>
    %c0_49 = arith.constant 0 : index
    %c0_50 = arith.constant 0 : index
    %c0_51 = arith.constant 0 : index
    %100 = vector.load %arg6[%c0_49, %c0_50, %c0_51] : memref<3x16x32xf32, #tpu.memory_space<vmem>>, vector<1x16x32xf32>
    %101 = vector.shape_cast %100 : vector<1x16x32xf32> to vector<16x32xf32>
    %cst_52 = arith.constant dense<0.000000e+00> : vector<16x128xf32>
    %102 = tpu.matmul %101, %94, %cst_52 {dimension_numbers = #tpu.dot_dimension_numbers<[1], [0], [0], [1], [0, 0, 1, 1], [], []>} : vector<16x32xf32>, vector<32x128xf32>, vector<16x128xf32> -> vector<16x128xf32>
    %c1_53 = arith.constant 1 : index
    %c0_54 = arith.constant 0 : index
    %c0_55 = arith.constant 0 : index
    %103 = vector.load %arg6[%c1_53, %c0_54, %c0_55] : memref<3x16x32xf32, #tpu.memory_space<vmem>>, vector<1x16x32xf32>
    %104 = vector.shape_cast %103 : vector<1x16x32xf32> to vector<16x32xf32>
    %cst_56 = arith.constant dense<0.000000e+00> : vector<16x128xf32>
    %105 = tpu.matmul %104, %89, %cst_56 {dimension_numbers = #tpu.dot_dimension_numbers<[1], [0], [0], [1], [0, 0, 1, 1], [], []>} : vector<16x32xf32>, vector<32x128xf32>, vector<16x128xf32> -> vector<16x128xf32>
    %106 = arith.addf %102, %105 : vector<16x128xf32>
    %c2_57 = arith.constant 2 : index
    %c0_58 = arith.constant 0 : index
    %c0_59 = arith.constant 0 : index
    %107 = vector.load %arg6[%c2_57, %c0_58, %c0_59] : memref<3x16x32xf32, #tpu.memory_space<vmem>>, vector<1x16x32xf32>
    %108 = vector.shape_cast %107 : vector<1x16x32xf32> to vector<16x32xf32>
    %cst_60 = arith.constant dense<0.000000e+00> : vector<16x128xf32>
    %109 = tpu.matmul %108, %99, %cst_60 {dimension_numbers = #tpu.dot_dimension_numbers<[1], [0], [0], [1], [0, 0, 1, 1], [], []>} : vector<16x32xf32>, vector<32x128xf32>, vector<16x128xf32> -> vector<16x128xf32>
    %110 = arith.addf %106, %109 : vector<16x128xf32>
    %c0_61 = arith.constant 0 : index
    %c0_62 = arith.constant 0 : index
    %111 = vector.load %arg7[%c0_61, %c0_62] : memref<16x1xf32, #tpu.memory_space<vmem>>, vector<16x1xf32>
    %112 = vector.broadcast %111 : vector<16x1xf32> to vector<16x128xf32>
    %113 = arith.addf %110, %112 : vector<16x128xf32>
    %cst_63 = arith.constant 0.000000e+00 : f32
    %114 = vector.broadcast %cst_63 : f32 to vector<16x128xf32>
    %115 = arith.maximumf %113, %114 : vector<16x128xf32>
    %c1_i32_64 = arith.constant 1 : i32
    %116 = tpu.dynamic_rotate %115 by %c1_i32_64 dim 1 : vector<16x128xf32>, i32 -> vector<16x128xf32>
    %cst_65 = arith.constant 0.000000e+00 : f32
    %117 = vector.shape_cast %18 : vector<1x128xi1> to vector<1x128xi1>
    %118 = vector.broadcast %117 : vector<1x128xi1> to vector<16x128xi1>
    %119 = vector.broadcast %cst_65 : f32 to vector<16x128xf32>
    %120 = arith.select %118, %116, %119 : vector<16x128xi1>, vector<16x128xf32>
    %c127_i32_66 = arith.constant 127 : i32
    %121 = tpu.dynamic_rotate %115 by %c127_i32_66 dim 1 : vector<16x128xf32>, i32 -> vector<16x128xf32>
    %cst_67 = arith.constant 0.000000e+00 : f32
    %122 = vector.shape_cast %36 : vector<1x128xi1> to vector<1x128xi1>
    %123 = vector.broadcast %122 : vector<1x128xi1> to vector<16x128xi1>
    %124 = vector.broadcast %cst_67 : f32 to vector<16x128xf32>
    %125 = arith.select %123, %121, %124 : vector<16x128xi1>, vector<16x128xf32>
    %c0_68 = arith.constant 0 : index
    %c0_69 = arith.constant 0 : index
    %c0_70 = arith.constant 0 : index
    %126 = vector.load %arg8[%c0_68, %c0_69, %c0_70] : memref<3x4x16xf32, #tpu.memory_space<vmem>>, vector<1x4x16xf32>
    %127 = vector.shape_cast %126 : vector<1x4x16xf32> to vector<4x16xf32>
    %cst_71 = arith.constant dense<0.000000e+00> : vector<4x128xf32>
    %128 = tpu.matmul %127, %120, %cst_71 {dimension_numbers = #tpu.dot_dimension_numbers<[1], [0], [0], [1], [0, 0, 1, 1], [], []>} : vector<4x16xf32>, vector<16x128xf32>, vector<4x128xf32> -> vector<4x128xf32>
    %c1_72 = arith.constant 1 : index
    %c0_73 = arith.constant 0 : index
    %c0_74 = arith.constant 0 : index
    %129 = vector.load %arg8[%c1_72, %c0_73, %c0_74] : memref<3x4x16xf32, #tpu.memory_space<vmem>>, vector<1x4x16xf32>
    %130 = vector.shape_cast %129 : vector<1x4x16xf32> to vector<4x16xf32>
    %cst_75 = arith.constant dense<0.000000e+00> : vector<4x128xf32>
    %131 = tpu.matmul %130, %115, %cst_75 {dimension_numbers = #tpu.dot_dimension_numbers<[1], [0], [0], [1], [0, 0, 1, 1], [], []>} : vector<4x16xf32>, vector<16x128xf32>, vector<4x128xf32> -> vector<4x128xf32>
    %132 = arith.addf %128, %131 : vector<4x128xf32>
    %c2_76 = arith.constant 2 : index
    %c0_77 = arith.constant 0 : index
    %c0_78 = arith.constant 0 : index
    %133 = vector.load %arg8[%c2_76, %c0_77, %c0_78] : memref<3x4x16xf32, #tpu.memory_space<vmem>>, vector<1x4x16xf32>
    %134 = vector.shape_cast %133 : vector<1x4x16xf32> to vector<4x16xf32>
    %cst_79 = arith.constant dense<0.000000e+00> : vector<4x128xf32>
    %135 = tpu.matmul %134, %125, %cst_79 {dimension_numbers = #tpu.dot_dimension_numbers<[1], [0], [0], [1], [0, 0, 1, 1], [], []>} : vector<4x16xf32>, vector<16x128xf32>, vector<4x128xf32> -> vector<4x128xf32>
    %136 = arith.addf %132, %135 : vector<4x128xf32>
    %c0_80 = arith.constant 0 : index
    %c0_81 = arith.constant 0 : index
    %137 = vector.load %arg9[%c0_80, %c0_81] : memref<4x1xf32, #tpu.memory_space<vmem>>, vector<4x1xf32>
    %138 = vector.broadcast %137 : vector<4x1xf32> to vector<4x128xf32>
    %139 = arith.addf %136, %138 : vector<4x128xf32>
    %cst_82 = arith.constant 0.000000e+00 : f32
    %140 = vector.broadcast %cst_82 : f32 to vector<4x128xf32>
    %141 = arith.maximumf %139, %140 : vector<4x128xf32>
    %c1_i32_83 = arith.constant 1 : i32
    %142 = tpu.dynamic_rotate %141 by %c1_i32_83 dim 1 : vector<4x128xf32>, i32 -> vector<4x128xf32>
    %cst_84 = arith.constant 0.000000e+00 : f32
    %143 = vector.shape_cast %18 : vector<1x128xi1> to vector<1x128xi1>
    %144 = vector.broadcast %143 : vector<1x128xi1> to vector<4x128xi1>
    %145 = vector.broadcast %cst_84 : f32 to vector<4x128xf32>
    %146 = arith.select %144, %142, %145 : vector<4x128xi1>, vector<4x128xf32>
    %c127_i32_85 = arith.constant 127 : i32
    %147 = tpu.dynamic_rotate %141 by %c127_i32_85 dim 1 : vector<4x128xf32>, i32 -> vector<4x128xf32>
    %cst_86 = arith.constant 0.000000e+00 : f32
    %148 = vector.shape_cast %36 : vector<1x128xi1> to vector<1x128xi1>
    %149 = vector.broadcast %148 : vector<1x128xi1> to vector<4x128xi1>
    %150 = vector.broadcast %cst_86 : f32 to vector<4x128xf32>
    %151 = arith.select %149, %147, %150 : vector<4x128xi1>, vector<4x128xf32>
    %c0_87 = arith.constant 0 : index
    %c0_88 = arith.constant 0 : index
    %c0_89 = arith.constant 0 : index
    %152 = vector.load %arg10[%c0_87, %c0_88, %c0_89] : memref<3x16x4xf32, #tpu.memory_space<vmem>>, vector<1x16x4xf32>
    %153 = vector.shape_cast %152 : vector<1x16x4xf32> to vector<16x4xf32>
    %cst_90 = arith.constant dense<0.000000e+00> : vector<16x128xf32>
    %154 = tpu.matmul %153, %146, %cst_90 {dimension_numbers = #tpu.dot_dimension_numbers<[1], [0], [0], [1], [0, 0, 1, 1], [], []>} : vector<16x4xf32>, vector<4x128xf32>, vector<16x128xf32> -> vector<16x128xf32>
    %c1_91 = arith.constant 1 : index
    %c0_92 = arith.constant 0 : index
    %c0_93 = arith.constant 0 : index
    %155 = vector.load %arg10[%c1_91, %c0_92, %c0_93] : memref<3x16x4xf32, #tpu.memory_space<vmem>>, vector<1x16x4xf32>
    %156 = vector.shape_cast %155 : vector<1x16x4xf32> to vector<16x4xf32>
    %cst_94 = arith.constant dense<0.000000e+00> : vector<16x128xf32>
    %157 = tpu.matmul %156, %141, %cst_94 {dimension_numbers = #tpu.dot_dimension_numbers<[1], [0], [0], [1], [0, 0, 1, 1], [], []>} : vector<16x4xf32>, vector<4x128xf32>, vector<16x128xf32> -> vector<16x128xf32>
    %158 = arith.addf %154, %157 : vector<16x128xf32>
    %c2_95 = arith.constant 2 : index
    %c0_96 = arith.constant 0 : index
    %c0_97 = arith.constant 0 : index
    %159 = vector.load %arg10[%c2_95, %c0_96, %c0_97] : memref<3x16x4xf32, #tpu.memory_space<vmem>>, vector<1x16x4xf32>
    %160 = vector.shape_cast %159 : vector<1x16x4xf32> to vector<16x4xf32>
    %cst_98 = arith.constant dense<0.000000e+00> : vector<16x128xf32>
    %161 = tpu.matmul %160, %151, %cst_98 {dimension_numbers = #tpu.dot_dimension_numbers<[1], [0], [0], [1], [0, 0, 1, 1], [], []>} : vector<16x4xf32>, vector<4x128xf32>, vector<16x128xf32> -> vector<16x128xf32>
    %162 = arith.addf %158, %161 : vector<16x128xf32>
    %c0_99 = arith.constant 0 : index
    %c0_100 = arith.constant 0 : index
    %163 = vector.load %arg11[%c0_99, %c0_100] : memref<16x1xf32, #tpu.memory_space<vmem>>, vector<16x1xf32>
    %164 = vector.broadcast %163 : vector<16x1xf32> to vector<16x128xf32>
    %165 = arith.addf %162, %164 : vector<16x128xf32>
    %cst_101 = arith.constant 0.000000e+00 : f32
    %166 = vector.broadcast %cst_101 : f32 to vector<16x128xf32>
    %167 = arith.maximumf %165, %166 : vector<16x128xf32>
    %c1_i32_102 = arith.constant 1 : i32
    %168 = tpu.dynamic_rotate %167 by %c1_i32_102 dim 1 : vector<16x128xf32>, i32 -> vector<16x128xf32>
    %cst_103 = arith.constant 0.000000e+00 : f32
    %169 = vector.shape_cast %18 : vector<1x128xi1> to vector<1x128xi1>
    %170 = vector.broadcast %169 : vector<1x128xi1> to vector<16x128xi1>
    %171 = vector.broadcast %cst_103 : f32 to vector<16x128xf32>
    %172 = arith.select %170, %168, %171 : vector<16x128xi1>, vector<16x128xf32>
    %c127_i32_104 = arith.constant 127 : i32
    %173 = tpu.dynamic_rotate %167 by %c127_i32_104 dim 1 : vector<16x128xf32>, i32 -> vector<16x128xf32>
    %cst_105 = arith.constant 0.000000e+00 : f32
    %174 = vector.shape_cast %36 : vector<1x128xi1> to vector<1x128xi1>
    %175 = vector.broadcast %174 : vector<1x128xi1> to vector<16x128xi1>
    %176 = vector.broadcast %cst_105 : f32 to vector<16x128xf32>
    %177 = arith.select %175, %173, %176 : vector<16x128xi1>, vector<16x128xf32>
    %c0_106 = arith.constant 0 : index
    %c0_107 = arith.constant 0 : index
    %c0_108 = arith.constant 0 : index
    %178 = vector.load %arg12[%c0_106, %c0_107, %c0_108] : memref<3x32x16xf32, #tpu.memory_space<vmem>>, vector<1x32x16xf32>
    %179 = vector.shape_cast %178 : vector<1x32x16xf32> to vector<32x16xf32>
    %cst_109 = arith.constant dense<0.000000e+00> : vector<32x128xf32>
    %180 = tpu.matmul %179, %172, %cst_109 {dimension_numbers = #tpu.dot_dimension_numbers<[1], [0], [0], [1], [0, 0, 1, 1], [], []>} : vector<32x16xf32>, vector<16x128xf32>, vector<32x128xf32> -> vector<32x128xf32>
    %c1_110 = arith.constant 1 : index
    %c0_111 = arith.constant 0 : index
    %c0_112 = arith.constant 0 : index
    %181 = vector.load %arg12[%c1_110, %c0_111, %c0_112] : memref<3x32x16xf32, #tpu.memory_space<vmem>>, vector<1x32x16xf32>
    %182 = vector.shape_cast %181 : vector<1x32x16xf32> to vector<32x16xf32>
    %cst_113 = arith.constant dense<0.000000e+00> : vector<32x128xf32>
    %183 = tpu.matmul %182, %167, %cst_113 {dimension_numbers = #tpu.dot_dimension_numbers<[1], [0], [0], [1], [0, 0, 1, 1], [], []>} : vector<32x16xf32>, vector<16x128xf32>, vector<32x128xf32> -> vector<32x128xf32>
    %184 = arith.addf %180, %183 : vector<32x128xf32>
    %c2_114 = arith.constant 2 : index
    %c0_115 = arith.constant 0 : index
    %c0_116 = arith.constant 0 : index
    %185 = vector.load %arg12[%c2_114, %c0_115, %c0_116] : memref<3x32x16xf32, #tpu.memory_space<vmem>>, vector<1x32x16xf32>
    %186 = vector.shape_cast %185 : vector<1x32x16xf32> to vector<32x16xf32>
    %cst_117 = arith.constant dense<0.000000e+00> : vector<32x128xf32>
    %187 = tpu.matmul %186, %177, %cst_117 {dimension_numbers = #tpu.dot_dimension_numbers<[1], [0], [0], [1], [0, 0, 1, 1], [], []>} : vector<32x16xf32>, vector<16x128xf32>, vector<32x128xf32> -> vector<32x128xf32>
    %188 = arith.addf %184, %187 : vector<32x128xf32>
    %c0_118 = arith.constant 0 : index
    %c0_119 = arith.constant 0 : index
    %189 = vector.load %arg13[%c0_118, %c0_119] : memref<32x1xf32, #tpu.memory_space<vmem>>, vector<32x1xf32>
    %190 = vector.broadcast %189 : vector<32x1xf32> to vector<32x128xf32>
    %191 = arith.addf %188, %190 : vector<32x128xf32>
    %cst_120 = arith.constant 0.000000e+00 : f32
    %192 = vector.broadcast %cst_120 : f32 to vector<32x128xf32>
    %193 = arith.maximumf %191, %192 : vector<32x128xf32>
    %c1_i32_121 = arith.constant 1 : i32
    %194 = tpu.dynamic_rotate %193 by %c1_i32_121 dim 1 : vector<32x128xf32>, i32 -> vector<32x128xf32>
    %cst_122 = arith.constant 0.000000e+00 : f32
    %195 = vector.shape_cast %18 : vector<1x128xi1> to vector<1x128xi1>
    %196 = vector.broadcast %195 : vector<1x128xi1> to vector<32x128xi1>
    %197 = vector.broadcast %cst_122 : f32 to vector<32x128xf32>
    %198 = arith.select %196, %194, %197 : vector<32x128xi1>, vector<32x128xf32>
    %c127_i32_123 = arith.constant 127 : i32
    %199 = tpu.dynamic_rotate %193 by %c127_i32_123 dim 1 : vector<32x128xf32>, i32 -> vector<32x128xf32>
    %cst_124 = arith.constant 0.000000e+00 : f32
    %200 = vector.shape_cast %36 : vector<1x128xi1> to vector<1x128xi1>
    %201 = vector.broadcast %200 : vector<1x128xi1> to vector<32x128xi1>
    %202 = vector.broadcast %cst_124 : f32 to vector<32x128xf32>
    %203 = arith.select %201, %199, %202 : vector<32x128xi1>, vector<32x128xf32>
    %c0_125 = arith.constant 0 : index
    %c0_126 = arith.constant 0 : index
    %c0_127 = arith.constant 0 : index
    %204 = vector.load %arg14[%c0_125, %c0_126, %c0_127] : memref<3x64x32xf32, #tpu.memory_space<vmem>>, vector<1x64x32xf32>
    %205 = vector.shape_cast %204 : vector<1x64x32xf32> to vector<64x32xf32>
    %cst_128 = arith.constant dense<0.000000e+00> : vector<64x128xf32>
    %206 = tpu.matmul %205, %198, %cst_128 {dimension_numbers = #tpu.dot_dimension_numbers<[1], [0], [0], [1], [0, 0, 1, 1], [], []>} : vector<64x32xf32>, vector<32x128xf32>, vector<64x128xf32> -> vector<64x128xf32>
    %c1_129 = arith.constant 1 : index
    %c0_130 = arith.constant 0 : index
    %c0_131 = arith.constant 0 : index
    %207 = vector.load %arg14[%c1_129, %c0_130, %c0_131] : memref<3x64x32xf32, #tpu.memory_space<vmem>>, vector<1x64x32xf32>
    %208 = vector.shape_cast %207 : vector<1x64x32xf32> to vector<64x32xf32>
    %cst_132 = arith.constant dense<0.000000e+00> : vector<64x128xf32>
    %209 = tpu.matmul %208, %193, %cst_132 {dimension_numbers = #tpu.dot_dimension_numbers<[1], [0], [0], [1], [0, 0, 1, 1], [], []>} : vector<64x32xf32>, vector<32x128xf32>, vector<64x128xf32> -> vector<64x128xf32>
    %210 = arith.addf %206, %209 : vector<64x128xf32>
    %c2_133 = arith.constant 2 : index
    %c0_134 = arith.constant 0 : index
    %c0_135 = arith.constant 0 : index
    %211 = vector.load %arg14[%c2_133, %c0_134, %c0_135] : memref<3x64x32xf32, #tpu.memory_space<vmem>>, vector<1x64x32xf32>
    %212 = vector.shape_cast %211 : vector<1x64x32xf32> to vector<64x32xf32>
    %cst_136 = arith.constant dense<0.000000e+00> : vector<64x128xf32>
    %213 = tpu.matmul %212, %203, %cst_136 {dimension_numbers = #tpu.dot_dimension_numbers<[1], [0], [0], [1], [0, 0, 1, 1], [], []>} : vector<64x32xf32>, vector<32x128xf32>, vector<64x128xf32> -> vector<64x128xf32>
    %214 = arith.addf %210, %213 : vector<64x128xf32>
    %c0_137 = arith.constant 0 : index
    %c0_138 = arith.constant 0 : index
    %215 = vector.load %arg15[%c0_137, %c0_138] : memref<64x1xf32, #tpu.memory_space<vmem>>, vector<64x1xf32>
    %216 = vector.broadcast %215 : vector<64x1xf32> to vector<64x128xf32>
    %217 = arith.addf %214, %216 : vector<64x128xf32>
    %cst_139 = arith.constant 0.000000e+00 : f32
    %218 = vector.broadcast %cst_139 : f32 to vector<64x128xf32>
    %219 = arith.maximumf %217, %218 : vector<64x128xf32>
    %c1_i32_140 = arith.constant 1 : i32
    %220 = tpu.dynamic_rotate %219 by %c1_i32_140 dim 1 : vector<64x128xf32>, i32 -> vector<64x128xf32>
    %cst_141 = arith.constant 0.000000e+00 : f32
    %221 = vector.shape_cast %18 : vector<1x128xi1> to vector<1x128xi1>
    %222 = vector.broadcast %221 : vector<1x128xi1> to vector<64x128xi1>
    %223 = vector.broadcast %cst_141 : f32 to vector<64x128xf32>
    %224 = arith.select %222, %220, %223 : vector<64x128xi1>, vector<64x128xf32>
    %c127_i32_142 = arith.constant 127 : i32
    %225 = tpu.dynamic_rotate %219 by %c127_i32_142 dim 1 : vector<64x128xf32>, i32 -> vector<64x128xf32>
    %cst_143 = arith.constant 0.000000e+00 : f32
    %226 = vector.shape_cast %36 : vector<1x128xi1> to vector<1x128xi1>
    %227 = vector.broadcast %226 : vector<1x128xi1> to vector<64x128xi1>
    %228 = vector.broadcast %cst_143 : f32 to vector<64x128xf32>
    %229 = arith.select %227, %225, %228 : vector<64x128xi1>, vector<64x128xf32>
    %c0_144 = arith.constant 0 : index
    %c0_145 = arith.constant 0 : index
    %c0_146 = arith.constant 0 : index
    %230 = vector.load %arg16[%c0_144, %c0_145, %c0_146] : memref<3x19x64xf32, #tpu.memory_space<vmem>>, vector<1x19x64xf32>
    %231 = vector.shape_cast %230 : vector<1x19x64xf32> to vector<19x64xf32>
    %cst_147 = arith.constant dense<0.000000e+00> : vector<19x128xf32>
    %232 = tpu.matmul %231, %224, %cst_147 {dimension_numbers = #tpu.dot_dimension_numbers<[1], [0], [0], [1], [0, 0, 1, 1], [], []>} : vector<19x64xf32>, vector<64x128xf32>, vector<19x128xf32> -> vector<19x128xf32>
    %c1_148 = arith.constant 1 : index
    %c0_149 = arith.constant 0 : index
    %c0_150 = arith.constant 0 : index
    %233 = vector.load %arg16[%c1_148, %c0_149, %c0_150] : memref<3x19x64xf32, #tpu.memory_space<vmem>>, vector<1x19x64xf32>
    %234 = vector.shape_cast %233 : vector<1x19x64xf32> to vector<19x64xf32>
    %cst_151 = arith.constant dense<0.000000e+00> : vector<19x128xf32>
    %235 = tpu.matmul %234, %219, %cst_151 {dimension_numbers = #tpu.dot_dimension_numbers<[1], [0], [0], [1], [0, 0, 1, 1], [], []>} : vector<19x64xf32>, vector<64x128xf32>, vector<19x128xf32> -> vector<19x128xf32>
    %236 = arith.addf %232, %235 : vector<19x128xf32>
    %c2_152 = arith.constant 2 : index
    %c0_153 = arith.constant 0 : index
    %c0_154 = arith.constant 0 : index
    %237 = vector.load %arg16[%c2_152, %c0_153, %c0_154] : memref<3x19x64xf32, #tpu.memory_space<vmem>>, vector<1x19x64xf32>
    %238 = vector.shape_cast %237 : vector<1x19x64xf32> to vector<19x64xf32>
    %cst_155 = arith.constant dense<0.000000e+00> : vector<19x128xf32>
    %239 = tpu.matmul %238, %229, %cst_155 {dimension_numbers = #tpu.dot_dimension_numbers<[1], [0], [0], [1], [0, 0, 1, 1], [], []>} : vector<19x64xf32>, vector<64x128xf32>, vector<19x128xf32> -> vector<19x128xf32>
    %240 = arith.addf %236, %239 : vector<19x128xf32>
    %c0_156 = arith.constant 0 : index
    %c0_157 = arith.constant 0 : index
    %241 = vector.load %arg17[%c0_156, %c0_157] : memref<19x1xf32, #tpu.memory_space<vmem>>, vector<19x1xf32>
    %242 = vector.broadcast %241 : vector<19x1xf32> to vector<19x128xf32>
    %243 = arith.addf %240, %242 : vector<19x128xf32>
    %244 = arith.negf %243 : vector<19x128xf32>
    %245 = math.exp %244 : vector<19x128xf32>
    %cst_158 = arith.constant 1.000000e+00 : f32
    %246 = vector.broadcast %cst_158 : f32 to vector<19x128xf32>
    %247 = arith.addf %246, %245 : vector<19x128xf32>
    %248 = arith.divf %246, %247 : vector<19x128xf32>
    %c0_159 = arith.constant 0 : index
    %c0_160 = arith.constant 0 : index
    %249 = vector.load %arg18[%c0_159, %c0_160] : memref<19x128xf32, #tpu.memory_space<vmem>>, vector<19x128xf32>
    tpu.vector_store %arg18[%c0_159, %c0_160], %248 {strides = array<i32>} : memref<19x128xf32, #tpu.memory_space<vmem>>, vector<19x128xf32>,
    return
  }
  func.func @transform_0(%arg0: i32) -> (i32, i32) {
    %c0_i32 = arith.constant 0 : i32
    %c0_i32_0 = arith.constant 0 : i32
    return %c0_i32, %arg0 : i32, i32
  }
  func.func @transform_1(%arg0: i32) -> (i32, i32, i32) {
    %c0_i32 = arith.constant 0 : i32
    %c0_i32_0 = arith.constant 0 : i32
    %c0_i32_1 = arith.constant 0 : i32
    %c0_i32_2 = arith.constant 0 : i32
    return %c0_i32, %c0_i32_0, %c0_i32_1 : i32, i32, i32
  }
  func.func @transform_2(%arg0: i32) -> (i32, i32) {
    %c0_i32 = arith.constant 0 : i32
    %c0_i32_0 = arith.constant 0 : i32
    %c0_i32_1 = arith.constant 0 : i32
    return %c0_i32, %c0_i32_0 : i32, i32
  }
  func.func @transform_3(%arg0: i32) -> (i32, i32, i32) {
    %c0_i32 = arith.constant 0 : i32
    %c0_i32_0 = arith.constant 0 : i32
    %c0_i32_1 = arith.constant 0 : i32
    %c0_i32_2 = arith.constant 0 : i32
    return %c0_i32, %c0_i32_0, %c0_i32_1 : i32, i32, i32
  }
  func.func @transform_4(%arg0: i32) -> (i32, i32) {
    %c0_i32 = arith.constant 0 : i32
    %c0_i32_0 = arith.constant 0 : i32
    %c0_i32_1 = arith.constant 0 : i32
    return %c0_i32, %c0_i32_0 : i32, i32
  }
  func.func @transform_5(%arg0: i32) -> (i32, i32, i32) {
    %c0_i32 = arith.constant 0 : i32
    %c0_i32_0 = arith.constant 0 : i32
    %c0_i32_1 = arith.constant 0 : i32
    %c0_i32_2 = arith.constant 0 : i32
    return %c0_i32, %c0_i32_0, %c0_i32_1 : i32, i32, i32
  }
  func.func @transform_6(%arg0: i32) -> (i32, i32) {
    %c0_i32 = arith.constant 0 : i32
    %c0_i32_0 = arith.constant 0 : i32
    %c0_i32_1 = arith.constant 0 : i32
    return %c0_i32, %c0_i32_0 : i32, i32
  }
  func.func @transform_7(%arg0: i32) -> (i32, i32, i32) {
    %c0_i32 = arith.constant 0 : i32
    %c0_i32_0 = arith.constant 0 : i32
    %c0_i32_1 = arith.constant 0 : i32
    %c0_i32_2 = arith.constant 0 : i32
    return %c0_i32, %c0_i32_0, %c0_i32_1 : i32, i32, i32
  }
  func.func @transform_8(%arg0: i32) -> (i32, i32) {
    %c0_i32 = arith.constant 0 : i32
    %c0_i32_0 = arith.constant 0 : i32
    %c0_i32_1 = arith.constant 0 : i32
    return %c0_i32, %c0_i32_0 : i32, i32
  }
  func.func @transform_9(%arg0: i32) -> (i32, i32, i32) {
    %c0_i32 = arith.constant 0 : i32
    %c0_i32_0 = arith.constant 0 : i32
    %c0_i32_1 = arith.constant 0 : i32
    %c0_i32_2 = arith.constant 0 : i32
    return %c0_i32, %c0_i32_0, %c0_i32_1 : i32, i32, i32
  }
  func.func @transform_10(%arg0: i32) -> (i32, i32) {
    %c0_i32 = arith.constant 0 : i32
    %c0_i32_0 = arith.constant 0 : i32
    %c0_i32_1 = arith.constant 0 : i32
    return %c0_i32, %c0_i32_0 : i32, i32
  }
  func.func @transform_11(%arg0: i32) -> (i32, i32, i32) {
    %c0_i32 = arith.constant 0 : i32
    %c0_i32_0 = arith.constant 0 : i32
    %c0_i32_1 = arith.constant 0 : i32
    %c0_i32_2 = arith.constant 0 : i32
    return %c0_i32, %c0_i32_0, %c0_i32_1 : i32, i32, i32
  }
  func.func @transform_12(%arg0: i32) -> (i32, i32) {
    %c0_i32 = arith.constant 0 : i32
    %c0_i32_0 = arith.constant 0 : i32
    %c0_i32_1 = arith.constant 0 : i32
    return %c0_i32, %c0_i32_0 : i32, i32
  }
  func.func @transform_13(%arg0: i32) -> (i32, i32, i32) {
    %c0_i32 = arith.constant 0 : i32
    %c0_i32_0 = arith.constant 0 : i32
    %c0_i32_1 = arith.constant 0 : i32
    %c0_i32_2 = arith.constant 0 : i32
    return %c0_i32, %c0_i32_0, %c0_i32_1 : i32, i32, i32
  }
  func.func @transform_14(%arg0: i32) -> (i32, i32) {
    %c0_i32 = arith.constant 0 : i32
    %c0_i32_0 = arith.constant 0 : i32
    %c0_i32_1 = arith.constant 0 : i32
    return %c0_i32, %c0_i32_0 : i32, i32
  }
  func.func @transform_15(%arg0: i32) -> (i32, i32, i32) {
    %c0_i32 = arith.constant 0 : i32
    %c0_i32_0 = arith.constant 0 : i32
    %c0_i32_1 = arith.constant 0 : i32
    %c0_i32_2 = arith.constant 0 : i32
    return %c0_i32, %c0_i32_0, %c0_i32_1 : i32, i32, i32
  }
  func.func @transform_16(%arg0: i32) -> (i32, i32) {
    %c0_i32 = arith.constant 0 : i32
    %c0_i32_0 = arith.constant 0 : i32
    %c0_i32_1 = arith.constant 0 : i32
    return %c0_i32, %c0_i32_0 : i32, i32
  }
  func.func @transform_17(%arg0: i32) -> (i32, i32) {
    %c0_i32 = arith.constant 0 : i32
    %c0_i32_0 = arith.constant 0 : i32
    return %c0_i32, %arg0 : i32, i32
  }
}

</mosaic_0001>

<bundles_post_ra>
// kernel: tpu_custom_call.1
= control target key start
LH: loop header
LB: loop body
LE: loop exit
PB: predicated region body
PF: predicated region fallthrough
CT: control target
= control target key end

     0   :  { %s5117_s0 = inlined_call_operand.vmem [shape: f32[19,128], index: 0, kind: input, shape index: {}]   ;;  %s5118_s1 = inlined_call_operand.vmem [shape: f32[3,64,19], index: 1, kind: input, shape index: {}]   ;;  %s5119_s2 = inlined_call_operand.vmem [shape: f32[64,1], index: 2, kind: input, shape index: {}]   ;;  %s5120_s3 = inlined_call_operand.vmem [shape: f32[3,32,64], index: 3, kind: input, shape index: {}]   ;;  %s5121_s4 = inlined_call_operand.vmem [shape: f32[32,1], index: 4, kind: input, shape index: {}]   ;;  %s5122_s5 = inlined_call_operand.vmem [shape: f32[3,16,32], index: 5, kind: input, shape index: {}]   ;;  %s5123_s6 = inlined_call_operand.vmem [shape: f32[16,1], index: 6, kind: input, shape index: {}]   ;;  %s5124_s7 = inlined_call_operand.vmem [shape: f32[3,4,16], index: 7, kind: input, shape index: {}]   ;;  %s5125_s8 = inlined_call_operand.vmem [shape: f32[4,1], index: 8, kind: input, shape index: {}]   ;;  %s5126_s9 = inlined_call_operand.vmem [shape: f32[3,16,4], index: 9, kind: input, shape index: {}]   ;;  %s5127_s10 = inlined_call_operand.vmem [shape: f32[16,1], index: 10, kind: input, shape index: {}]   ;;  %s5128_s11 = inlined_call_operand.vmem [shape: f32[3,32,16], index: 11, kind: input, shape index: {}]   ;;  %s5129_s12 = inlined_call_operand.vmem [shape: f32[32,1], index: 12, kind: input, shape index: {}]   ;;  %s5130_s13 = inlined_call_operand.vmem [shape: f32[3,64,32], index: 13, kind: input, shape index: {}]   ;;  %s5131_s14 = inlined_call_operand.vmem [shape: f32[64,1], index: 14, kind: input, shape index: {}]   ;;  %s5132_s15 = inlined_call_operand.vmem [shape: f32[3,19,64], index: 15, kind: input, shape index: {}]   ;;  %s5133_s16 = inlined_call_operand.vmem [shape: f32[19,1], index: 16, kind: input, shape index: {}]   ;;  %s5134_s17 = inlined_call_operand.hbm [shape: f32[19,128], index: 17, kind: output, shape index: {}]  }
   0x1   :  { %5137 = sst [smem:[#allocation5_spill]] %s5117_s0 }
   0x2   :  { %5138 = sst [smem:[#allocation6_spill]] %s5118_s1 }
   0x3   :  { %s5139_s26 = sld [smem:[#allocation5_spill]]  ;;  %s5140_s30 = sld [smem:[#allocation6_spill]]  ;;  %vm115_vm0 = vcmask 154624   ;;  %vm140_vm1 = vcmask 1042432  }
   0x4   :  { %s4302_s18 = smov 1   ;;  %s4303_s19 = smov 127  }
   0x9   :  { %v73_v0 = vld [vmem:[%s5139_s26] sm:$0xff]  ;;  %v74_v1 = vld [vmem:[%s5139_s26 + $0x8] sm:$0xff]  ;;  %v75_v5 = vld [vmem:[%s5139_s26 + $0x10] sm:$0x7] }
   0xa   :  { %v4114_v2 = vpack.i.bf16 %v74_v1, %v73_v0  ;;  %v3834_v3 = vpack.c.bf16 %v74_v1, %v73_v0  ;;  %v3059_v4 = vld [vmem:[%s5140_s30 + $0x40] sm:$0xff] }
   0xb   :  { %3486 = vmatprep.mubr.msk.f32.mxu0 %vm115_vm0, %v3059_v4 }
   0xc   :  { %4115 = vrot.lane.b32.xlu0 %v4114_v2, %s4302_s18  ;;  %4120 = vrot.lane.b32.xlu1 %v4114_v2, %s4303_s19 }
   0xd   :  { %3835 = vmatprep.subr.bf16.mxu0 %v3834_v3 }
   0xe   :  { %3837 = vmatpush3.bf16.msra.mxu0 %v3834_v3 }
   0xf   :  { %3484 = vmatprep.subr.msk.mxu0 %vm140_vm1, %v75_v5 }
  0x10   :  { %22 = vsyncpa [#allocation3], 0  ;;  %80 = vrot.lane.b32.xlu0 %v75_v5, %s4302_s18  ;;  %91 = vrot.lane.b32.xlu1 %v75_v5, %s4303_s19  ;;  %v3060_v6 = vld [vmem:[%s5140_s30 + $0x48] sm:$0xff]  ;;  %v3061_v7 = vld [vmem:[%s5140_s30 + $0x50] sm:$0xff]  ;;  %v4304_v16 = vmov 0   ;;  %v57_v23 = vlaneseq  ;;  %vm651_vm6 = vcmask 523264  }
  0x11   :  { %v3062_v8 = vld [vmem:[%s5140_s30 + $0x58] sm:$0xff]  ;;  %v3063_v9 = vld [vmem:[%s5140_s30 + $0x60] sm:$0xff]  ;;  %v3064_v10 = vld [vmem:[%s5140_s30 + $0x68] sm:$0xff]  ;;  %4125 = vset.pattern.permute.xlu1 %v4304_v16  ;;  %4124 = vset.pattern.permute.xlu0 %v4304_v16  ;;  %vm1013_vm7 = vcmask 261120   ;;  %vm4306_vm8 = vmmov 0   ;;  %vm1293_vm9 = vcmask 130048  }
  0x12   :  { %3485 = vmatpush3.msk.msra.mxu0 %vm140_vm1, %v75_v5  ;;  %v3065_v11 = vld [vmem:[%s5140_s30 + $0x70] sm:$0xff]  ;;  %v3066_v12 = vld [vmem:[%s5140_s30 + $0x78] sm:$0xff]  ;;  %v98_v13 = vld [vmem:[%s5140_s30] sm:$0xff]  ;;  %v58_v24 = vand.u32 127, %v57_v23  ;;  %vm1535_vm10 = vcmask 31744   ;;  %vm1542_vm11 = vcmask 1043456  }
  0x13   :  { %3487 = vmatmul.mubr.msk.f32.vlgmr.msra.gmra.mrb[0].mxu0 %vm115_vm0, %v3060_v6  ;;  %v531_v14 = vld [vmem:[%s5119_s2 + $0x8] sm:$0xff]  ;;  %v530_v15 = vld [vmem:[%s5119_s2] sm:$0xff]  ;;  %v532_v17 = vld [vmem:[%s5119_s2 + $0x10] sm:$0xff] }
  0x14   :  { %3489 = vmatprep.mubr.msk.f32.mxu0 %vm115_vm0, %v3061_v7  ;;  %545 = vperm.xlu1 %4125, %v531_v14   ;;  %v533_v18 = vld [vmem:[%s5119_s2 + $0x18] sm:$0xff]  ;;  %v534_v19 = vld [vmem:[%s5119_s2 + $0x20] sm:$0xff]  ;;  %v535_v20 = vld [vmem:[%s5119_s2 + $0x28] sm:$0xff]  ;;  %v63_v25 = vand.u32 15, %v58_v24 }
  0x15   :  { %540 = vperm.xlu0 %4124, %v530_v15   ;;  %v536_v21 = vld [vmem:[%s5119_s2 + $0x30] sm:$0xff]  ;;  %v537_v22 = vld [vmem:[%s5119_s2 + $0x38] sm:$0xff]  ;;  %v99_v40 = vld [vmem:[%s5140_s30 + $0x8] sm:$0xff] }
  0x16   :  { %vm4476_vm2 = vcmp.ne.s32.totalorder %v63_v25, 0  ;;  %vm4491_vm4 = vcmp.ne.s32.totalorder %v63_v25, 15  ;;  %v100_v42 = vld [vmem:[%s5140_s30 + $0x10] sm:$0xff]  ;;  %v101_v44 = vld [vmem:[%s5140_s30 + $0x18] sm:$0xff]  ;;  %v102_v45 = vld [vmem:[%s5140_s30 + $0x20] sm:$0xff] }
  0x17   :  { %3490 = vmatmul.mubr.msk.f32.gmra.mrb[2].mxu0 %vm115_vm0, %v3062_v8  ;;  %vm4483_vm3 = vmpackc.low %vm4476_vm2, %vm4476_vm2  ;;  %v103_v46 = vld [vmem:[%s5140_s30 + $0x28] sm:$0xff]  ;;  %v104_v47 = vld [vmem:[%s5140_s30 + $0x30] sm:$0xff] }
  0x18   :  { %3492 = vmatprep.mubr.msk.f32.mxu0 %vm115_vm0, %v3063_v9  ;;  %550 = vperm.xlu1 %4125, %v532_v17   ;;  %vm4504_vm5 = vmpackc.low %vm4491_vm4, %vm4491_vm4  ;;  %v105_v48 = vld [vmem:[%s5140_s30 + $0x38] sm:$0xff]  ;;  %v3087_v49 = vld [vmem:[%s5140_s30 + $0x80] sm:$0xff] }
  0x19   :  { %555 = vperm.xlu0 %4124, %v533_v18   ;;  %v3088_v50 = vld [vmem:[%s5140_s30 + $0x88] sm:$0xff]  ;;  %v3089_v51 = vld [vmem:[%s5140_s30 + $0x90] sm:$0xff]  ;;  %v3090_v52 = vld [vmem:[%s5140_s30 + $0x98] sm:$0xff] }
  0x1a   :  { %v3091_v53 = vld [vmem:[%s5140_s30 + $0xa0] sm:$0xff]  ;;  %v3092_v54 = vld [vmem:[%s5140_s30 + $0xa8] sm:$0xff]  ;;  %v3093_v55 = vld [vmem:[%s5140_s30 + $0xb0] sm:$0xff] }
  0x1b   :  { %3493 = vmatmul.mubr.msk.f32.gmra.mrb[4].mxu0 %vm115_vm0, %v3064_v10  ;;  %v3094_v56 = vld [vmem:[%s5140_s30 + $0xb8] sm:$0xff]  ;;  %v3106_v59 = vld [vmem:[%s5120_s3 + $0x20] sm:$0xff]  ;;  %v3178_v26 = vld [vmem:[%s5126_s9 + $0x28] sm:$0xff] }
  0x1c   :  { %3495 = vmatprep.mubr.msk.f32.mxu0 %vm115_vm0, %v3065_v11  ;;  %560 = vperm.xlu1 %4125, %v534_v19   ;;  %v3182_v37 = vld [vmem:[%s5128_s11 + $0x20] sm:$0xff]  ;;  %v2721_v31 = vld [vmem:[%s5132_s15 + $0x8] sm:$0xff]  ;;  %v3272_v41 = vld [vmem:[%s5132_s15 + $0x38] sm:$0xff] }
  0x1d   :  { %565 = vperm.xlu0 %4124, %v535_v20   ;;  %3550 = vmatprep.mubr.msk.f32.mxu1 %vm651_vm6, %v3106_v59 }
  0x1f   :  { %3496 = vmatmul.mubr.msk.f32.gmra.mrb[6].mxu0 %vm115_vm0, %v3066_v12 }
  0x20   :  { %3504 = vmatprep.mubr.msk.f32.mxu0 %vm115_vm0, %v98_v13  ;;  %570 = vperm.xlu1 %4125, %v536_v21  }
  0x21   :  { %575 = vperm.xlu0 %4124, %v537_v22  }
  0x7e   :  { %v4116_v27 = vpop.permute.xlu0 %4115  ;;  %v4121_v28 = vpop.permute.xlu1 %4120 }
  0x7f   :  { %v4118_v29 = vunpack.i.h.bf16 %v4116_v27  ;;  %v4117_v30 = vunpack.i.l.bf16 %v4116_v27  ;;  %v4123_v33 = vunpack.i.h.bf16 %v4121_v28  ;;  %v4122_v34 = vunpack.i.l.bf16 %v4121_v28 }
  0x81   :  { %v3838_v32 = vpack.c.bf16 %v4118_v29, %v4117_v30  ;;  %v3844_v38 = vpack.c.bf16 %v4123_v33, %v4122_v34 }
  0x82   :  { %v81_v35 = vpop.permute.xlu0 %80  ;;  %v92_v39 = vpop.permute.xlu1 %91 }
  0x83   :  { %3840 = vmatprep.subr.msk.bf16.mxu0 %vm4483_vm3, %v3838_v32  ;;  %v86_v36 = vsel %vm4476_vm2, %v81_v35, 0.0  ;;  %v97_v43 = vsel %vm4491_vm4, %v92_v39, 0.0  ;;  %v952_v39 = vld [vmem:[%s5121_s4] sm:$0xff] }
  0x84   :  { %3843 = vmatpush3.bf16.msk.msra.mxu0 %vm4483_vm3, %v3838_v32 }
  0x85   :  { %3502 = vmatprep.subr.msk.mxu0 %vm140_vm1, %v86_v36 }
  0x88   :  { %3503 = vmatpush3.msk.msra.mxu0 %vm140_vm1, %v86_v36  ;;  %v3107_v36 = vld [vmem:[%s5120_s3 + $0x28] sm:$0xff] }
  0x89   :  { %3505 = vmatmul.mubr.msk.f32.vlgmr.msra.gmra.mrb[0].mxu0 %vm115_vm0, %v99_v40  ;;  %3846 = vmatprep.subr.msk.bf16.mxu0 %vm4504_vm5, %v3844_v38  ;;  %v3109_v40 = vld [vmem:[%s5120_s3 + $0x38] sm:$0xff] }
  0x8a   :  { %3507 = vmatprep.mubr.msk.f32.mxu0 %vm115_vm0, %v100_v42  ;;  %3849 = vmatpush3.bf16.msk.msra.mxu0 %vm4504_vm5, %v3844_v38  ;;  %v3108_v38 = vld [vmem:[%s5120_s3 + $0x30] sm:$0xff]  ;;  %v642_v42 = vld [vmem:[%s5120_s3] sm:$0xff] }
  0x8b   :  { %3520 = vmatprep.subr.msk.mxu0 %vm140_vm1, %v97_v43 }
  0x8d   :  { %3508 = vmatmul.mubr.msk.f32.gmra.mrb[2].mxu0 %vm115_vm0, %v101_v44  ;;  %v953_v44 = vld [vmem:[%s5121_s4 + $0x8] sm:$0xff] }
  0x8e   :  { %3510 = vmatprep.mubr.msk.f32.mxu0 %vm115_vm0, %v102_v45  ;;  %3521 = vmatpush3.msk.msra.mxu0 %vm140_vm1, %v97_v43  ;;  %v954_v43 = vld [vmem:[%s5121_s4 + $0x10] sm:$0xff]  ;;  %v955_v45 = vld [vmem:[%s5121_s4 + $0x18] sm:$0xff] }
  0x91   :  { %3511 = vmatmul.mubr.msk.f32.gmra.mrb[4].mxu0 %vm115_vm0, %v103_v46 }
  0x92   :  { %3513 = vmatprep.mubr.msk.f32.mxu0 %vm115_vm0, %v104_v47 }
  0x93   :  { %v546_v58 = vpop.permute.xlu1 %545 }
  0x94   :  { %v541_v57 = vpop.permute.xlu0 %540 }
  0x95   :  { %3514 = vmatmul.mubr.msk.f32.gmra.mrb[6].mxu0 %vm115_vm0, %v105_v48 }
  0x96   :  { %3522 = vmatprep.mubr.msk.f32.mxu0 %vm115_vm0, %v3087_v49 }
  0x97   :  { %v551_v62 = vpop.permute.xlu1 %550 }
  0x98   :  { %v556_v60 = vpop.permute.xlu0 %555 }
  0x99   :  { %3523 = vmatmul.mubr.msk.f32.vlgmr.msra.gmra.mrb[0].mxu0 %vm115_vm0, %v3088_v50 }
  0x9a   :  { %3525 = vmatprep.mubr.msk.f32.mxu0 %vm115_vm0, %v3089_v51 }
  0x9b   :  { %v561_v11 = vpop.permute.xlu1 %560 }
  0x9c   :  { %v566_v7 = vpop.permute.xlu0 %565 }
  0x9d   :  { %3526 = vmatmul.mubr.msk.f32.gmra.mrb[2].mxu0 %vm115_vm0, %v3090_v52 }
  0x9e   :  { %3528 = vmatprep.mubr.msk.f32.mxu0 %vm115_vm0, %v3091_v53 }
  0x9f   :  { %v571_v24 = vpop.permute.xlu1 %570 }
  0xa0   :  { %v576_v21 = vpop.permute.xlu0 %575 }
  0xa1   :  { %3529 = vmatmul.mubr.msk.f32.gmra.mrb[4].mxu0 %vm115_vm0, %v3092_v54 }
  0xa2   :  { %3531 = vmatprep.mubr.msk.f32.mxu0 %vm115_vm0, %v3093_v55 }
  0xa5   :  { %3532 = vmatmul.mubr.msk.f32.gmra.mrb[6].mxu0 %vm115_vm0, %v3094_v56 }
 0x16c   :  { %v3524_v61 = vpop.f32.mrb[0].mxu0 }
 0x16d   :  { %v579_v63 = vadd.f32 %v3524_v61, %v546_v58  ;;  %v483_v0 = vpop.f32.mrb[1].mxu0 }
 0x16e   :  { %v578_v1 = vadd.f32 %v541_v57, %v483_v0 }
 0x16f   :  { %v587_v2 = vmax.f32 %v579_v63, 0.0 }
 0x170   :  { %v586_v3 = vmax.f32 %v578_v1, 0.0  ;;  %v3527_v4 = vpop.f32.mrb[2].mxu0 }
 0x171   :  { %v581_v5 = vadd.f32 %v3527_v4, %v556_v60  ;;  %v493_v6 = vpop.f32.mrb[3].mxu0 }
 0x172   :  { %v580_v8 = vadd.f32 %v551_v62, %v493_v6  ;;  %v4126_v9 = vpack.i.bf16 %v587_v2, %v586_v3  ;;  %v3850_v10 = vpack.c.bf16 %v587_v2, %v586_v3  ;;  %v643_v6 = vld [vmem:[%s5120_s3 + $0x8] sm:$0xff] }
 0x173   :  { %v589_v12 = vmax.f32 %v581_v5, 0.0 }
 0x174   :  { %v588_v13 = vmax.f32 %v580_v8, 0.0  ;;  %4127 = vrot.lane.b32.xlu1 %v4126_v9, %s4302_s18  ;;  %v3530_v14 = vpop.f32.mrb[4].mxu0  ;;  %3851 = vmatprep.subr.bf16.mxu1 %v3850_v10 }
 0x175   :  { %v583_v15 = vadd.f32 %v3530_v14, %v566_v7  ;;  %v503_v16 = vpop.f32.mrb[5].mxu0  ;;  %3853 = vmatpush3.bf16.msra.mxu1 %v3850_v10  ;;  %v644_v7 = vld [vmem:[%s5120_s3 + $0x10] sm:$0xff] }
 0x176   :  { %v582_v17 = vadd.f32 %v561_v11, %v503_v16  ;;  %v4131_v18 = vpack.i.bf16 %v589_v12, %v588_v13  ;;  %v3854_v19 = vpack.c.bf16 %v589_v12, %v588_v13  ;;  %v645_v12 = vld [vmem:[%s5120_s3 + $0x18] sm:$0xff]  ;;  %v3126_v13 = vld [vmem:[%s5120_s3 + $0x40] sm:$0xff] }
 0x177   :  { %v591_v20 = vmax.f32 %v583_v15, 0.0 }
 0x178   :  { %v590_v22 = vmax.f32 %v582_v17, 0.0  ;;  %4132 = vrot.lane.b32.xlu0 %v4131_v18, %s4302_s18  ;;  %v3533_v23 = vpop.f32.mrb[6].mxu0  ;;  %3855 = vmatprep.subr.bf16.mxu1 %v3854_v19 }
 0x179   :  { %v585_v25 = vadd.f32 %v3533_v23, %v576_v21  ;;  %v513_v27 = vpop.f32.mrb[7].mxu0  ;;  %3857 = vmatpush3.bf16.msra.mxu1 %v3854_v19  ;;  %v3128_v19 = vld [vmem:[%s5120_s3 + $0x50] sm:$0xff] }
 0x17a   :  { %v584_v28 = vadd.f32 %v571_v24, %v513_v27  ;;  %v4136_v29 = vpack.i.bf16 %v591_v20, %v590_v22  ;;  %v3858_v30 = vpack.c.bf16 %v591_v20, %v590_v22  ;;  %v3129_v20 = vld [vmem:[%s5120_s3 + $0x58] sm:$0xff]  ;;  %v3142_v21 = vld [vmem:[%s5122_s5 + $0x10] sm:$0xff] }
 0x17b   :  { %v593_v32 = vmax.f32 %v585_v25, 0.0  ;;  %3608 = vmatprep.mubr.msk.f32.mxu0 %vm1013_vm7, %v3142_v21 }
 0x17c   :  { %v592_v33 = vmax.f32 %v584_v28, 0.0  ;;  %4137 = vrot.lane.b32.xlu1 %v4136_v29, %s4302_s18  ;;  %3859 = vmatprep.subr.bf16.mxu1 %v3858_v30 }
 0x17d   :  { %3861 = vmatpush3.bf16.msra.mxu1 %v3858_v30 }
 0x17e   :  { %v4141_v34 = vpack.i.bf16 %v593_v32, %v592_v33  ;;  %v3862_v35 = vpack.c.bf16 %v593_v32, %v592_v33 }
 0x180   :  { %4147 = vrot.lane.b32.xlu1 %v4126_v9, %s4303_s19  ;;  %4142 = vrot.lane.b32.xlu0 %v4141_v34, %s4302_s18 }
 0x181   :  { %3863 = vmatprep.subr.bf16.mxu1 %v3862_v35 }
 0x182   :  { %3865 = vmatpush3.bf16.msra.mxu1 %v3862_v35 }
 0x184   :  { %4157 = vrot.lane.b32.xlu1 %v4136_v29, %s4303_s19  ;;  %4152 = vrot.lane.b32.xlu0 %v4131_v18, %s4303_s19  ;;  %v3127_v18 = vld [vmem:[%s5120_s3 + $0x48] sm:$0xff] }
 0x185   :  { %3551 = vmatmul.mubr.msk.f32.vlgmr.msra.gmra.mrb[0].mxu1 %vm651_vm6, %v3107_v36 }
 0x186   :  { %3553 = vmatprep.mubr.msk.f32.mxu1 %vm651_vm6, %v3108_v38 }
 0x188   :  { %958 = vperm.xlu1 %4125, %v952_v39   ;;  %4162 = vrot.lane.b32.xlu0 %v4141_v34, %s4303_s19 }
 0x189   :  { %3554 = vmatmul.mubr.msk.f32.gmra.mrb[2].mxu1 %vm651_vm6, %v3109_v40 }
 0x18a   :  { %3572 = vmatprep.mubr.msk.f32.mxu1 %vm651_vm6, %v642_v42 }
 0x18c   :  { %968 = vperm.xlu1 %4125, %v954_v43   ;;  %963 = vperm.xlu0 %4124, %v953_v44  }
 0x190   :  { %973 = vperm.xlu0 %4124, %v955_v45  }
 0x1e6   :  { %v4128_v46 = vpop.permute.xlu1 %4127 }
 0x1e7   :  { %v4130_v47 = vunpack.i.h.bf16 %v4128_v46  ;;  %v4129_v48 = vunpack.i.l.bf16 %v4128_v46  ;;  %v1262_v46 = vld [vmem:[%s5123_s6] sm:$0xff] }
 0x1e9   :  { %v3866_v49 = vpack.c.bf16 %v4130_v47, %v4129_v48  ;;  %v3143_v47 = vld [vmem:[%s5122_s5 + $0x18] sm:$0xff]  ;;  %v1008_v48 = vld [vmem:[%s5122_s5] sm:$0xff] }
 0x1ea   :  { %v4133_v50 = vpop.permute.xlu0 %4132 }
 0x1eb   :  { %v4135_v51 = vunpack.i.h.bf16 %v4133_v50  ;;  %v4134_v52 = vunpack.i.l.bf16 %v4133_v50  ;;  %3868 = vmatprep.subr.msk.bf16.mxu1 %vm4483_vm3, %v3866_v49 }
 0x1ec   :  { %3871 = vmatpush3.bf16.msk.msra.mxu1 %vm4483_vm3, %v3866_v49  ;;  %v1263_v49 = vld [vmem:[%s5123_s6 + $0x8] sm:$0xff] }
 0x1ed   :  { %v3872_v53 = vpack.c.bf16 %v4135_v51, %v4134_v52 }
 0x1ee   :  { %v4138_v54 = vpop.permute.xlu1 %4137 }
 0x1ef   :  { %v4140_v55 = vunpack.i.h.bf16 %v4138_v54  ;;  %v4139_v56 = vunpack.i.l.bf16 %v4138_v54  ;;  %3874 = vmatprep.subr.msk.bf16.mxu1 %vm4483_vm3, %v3872_v53 }
 0x1f0   :  { %3877 = vmatpush3.bf16.msk.msra.mxu1 %vm4483_vm3, %v3872_v53 }
 0x1f1   :  { %v3878_v57 = vpack.c.bf16 %v4140_v55, %v4139_v56 }
 0x1f2   :  { %v4148_v58 = vpop.permute.xlu1 %4147  ;;  %v4143_v59 = vpop.permute.xlu0 %4142 }
 0x1f3   :  { %v4150_v60 = vunpack.i.h.bf16 %v4148_v58  ;;  %v4149_v61 = vunpack.i.l.bf16 %v4148_v58  ;;  %v4145_v62 = vunpack.i.h.bf16 %v4143_v59  ;;  %v4144_v63 = vunpack.i.l.bf16 %v4143_v59  ;;  %3880 = vmatprep.subr.msk.bf16.mxu1 %vm4483_vm3, %v3878_v57 }
 0x1f4   :  { %3883 = vmatpush3.bf16.msk.msra.mxu1 %vm4483_vm3, %v3878_v57 }
 0x1f5   :  { %v3884_v0 = vpack.c.bf16 %v4145_v62, %v4144_v63  ;;  %v3890_v2 = vpack.c.bf16 %v4150_v60, %v4149_v61 }
 0x1f6   :  { %v4153_v1 = vpop.permute.xlu0 %4152  ;;  %v4158_v5 = vpop.permute.xlu1 %4157 }
 0x1f7   :  { %v4155_v3 = vunpack.i.h.bf16 %v4153_v1  ;;  %v4154_v4 = vunpack.i.l.bf16 %v4153_v1  ;;  %3886 = vmatprep.subr.msk.bf16.mxu1 %vm4483_vm3, %v3884_v0  ;;  %v4160_v8 = vunpack.i.h.bf16 %v4158_v5  ;;  %v4159_v9 = vunpack.i.l.bf16 %v4158_v5  ;;  %v1009_v1 = vld [vmem:[%s5122_s5 + $0x8] sm:$0xff] }
 0x1f8   :  { %3889 = vmatpush3.bf16.msk.msra.mxu1 %vm4483_vm3, %v3884_v0  ;;  %v4305_v5 = vmov 0.0|0.0  }
 0x1f9   :  { %3892 = vmatprep.subr.msk.bf16.mxu1 %vm4504_vm5, %v3890_v2  ;;  %v3896_v10 = vpack.c.bf16 %v4155_v3, %v4154_v4  ;;  %v3902_v14 = vpack.c.bf16 %v4160_v8, %v4159_v9  ;;  %v3153_v4 = vld [vmem:[%s5122_s5 + $0x28] sm:$0xff]  ;;  %v4307_v8 = vmov 0.0  }
 0x1fa   :  { %v4163_v11 = vpop.permute.xlu0 %4162 }
 0x1fb   :  { %3573 = vmatmul.mubr.msk.f32.vlgmr.msra.gmra.mrb[0].mxu1 %vm651_vm6, %v643_v6  ;;  %v4165_v15 = vunpack.i.h.bf16 %v4163_v11  ;;  %v4164_v16 = vunpack.i.l.bf16 %v4163_v11 }
 0x1fc   :  { %3895 = vmatpush3.bf16.msk.msra.mxu1 %vm4504_vm5, %v3890_v2  ;;  %3575 = vmatprep.mubr.msk.f32.mxu1 %vm651_vm6, %v644_v7  ;;  %v3152_v2 = vld [vmem:[%s5122_s5 + $0x20] sm:$0xff] }
 0x1fd   :  { %3898 = vmatprep.subr.msk.bf16.mxu1 %vm4504_vm5, %v3896_v10  ;;  %v3908_v17 = vpack.c.bf16 %v4165_v15, %v4164_v16 }
 0x1ff   :  { %3576 = vmatmul.mubr.msk.f32.gmra.mrb[2].mxu1 %vm651_vm6, %v645_v12 }
 0x200   :  { %3901 = vmatpush3.bf16.msk.msra.mxu1 %vm4504_vm5, %v3896_v10  ;;  %3594 = vmatprep.mubr.msk.f32.mxu1 %vm651_vm6, %v3126_v13 }
 0x201   :  { %3904 = vmatprep.subr.msk.bf16.mxu1 %vm4504_vm5, %v3902_v14 }
 0x204   :  { %3907 = vmatpush3.bf16.msk.msra.mxu1 %vm4504_vm5, %v3902_v14 }
 0x205   :  { %3910 = vmatprep.subr.msk.bf16.mxu1 %vm4504_vm5, %v3908_v17 }
 0x207   :  { %v959_v23 = vpop.permute.xlu1 %958 }
 0x208   :  { %3913 = vmatpush3.bf16.msk.msra.mxu1 %vm4504_vm5, %v3908_v17  ;;  %v1516_v17 = vld [vmem:[%s5125_s8] sm:$0xf] }
 0x209   :  { %3949 = vmatprep.subr.bf16.mxu1 %v4305_v5 }
 0x20b   :  { %3595 = vmatmul.mubr.msk.f32.vlgmr.msra.gmra.mrb[0].mxu1 %vm651_vm6, %v3127_v18  ;;  %v964_v22 = vpop.permute.xlu0 %963  ;;  %v969_v34 = vpop.permute.xlu1 %968  ;;  %v3160_v18 = vld [vmem:[%s5124_s7 + $0x4] sm:$0xf] }
 0x20c   :  { %3597 = vmatprep.mubr.msk.f32.mxu1 %vm651_vm6, %v3128_v19 }
 0x20f   :  { %3598 = vmatmul.mubr.msk.f32.gmra.mrb[2].mxu1 %vm651_vm6, %v3129_v20  ;;  %v974_v30 = vpop.permute.xlu0 %973 }
 0x210   :  { %3644 = vmatprep.mubr.msk.f32.mxu1 %vm4306_vm8, %v4307_v8 }
 0x2de   :  { %v3596_v24 = vpop.f32.mrb[0].mxu1 }
 0x2df   :  { %v977_v25 = vadd.f32 %v3596_v24, %v964_v22  ;;  %v929_v27 = vpop.f32.mrb[1].mxu1 }
 0x2e0   :  { %v976_v28 = vadd.f32 %v959_v23, %v929_v27  ;;  %v1290_v27 = vld [vmem:[%s5124_s7] sm:$0xf] }
 0x2e1   :  { %v981_v29 = vmax.f32 %v977_v25, 0.0 }
 0x2e2   :  { %v980_v32 = vmax.f32 %v976_v28, 0.0  ;;  %v3599_v33 = vpop.f32.mrb[2].mxu1 }
 0x2e3   :  { %v979_v35 = vadd.f32 %v3599_v33, %v974_v30  ;;  %v939_v36 = vpop.f32.mrb[3].mxu1  ;;  %v3169_v33 = vld [vmem:[%s5126_s9 + $0x10] sm:$0xff] }
 0x2e4   :  { %v978_v38 = vadd.f32 %v969_v34, %v939_v36  ;;  %v4166_v39 = vpack.i.bf16 %v981_v29, %v980_v32  ;;  %v3914_v40 = vpack.c.bf16 %v981_v29, %v980_v32  ;;  %v3165_v29 = vld [vmem:[%s5124_s7 + $0x8] sm:$0xf] }
 0x2e5   :  { %v983_v42 = vmax.f32 %v979_v35, 0.0 }
 0x2e6   :  { %v982_v43 = vmax.f32 %v978_v38, 0.0  ;;  %4167 = vrot.lane.b32.xlu1 %v4166_v39, %s4302_s18  ;;  %3915 = vmatprep.subr.bf16.mxu0 %v3914_v40 }
 0x2e7   :  { %3917 = vmatpush3.bf16.msra.mxu0 %v3914_v40 }
 0x2e8   :  { %v4171_v44 = vpack.i.bf16 %v983_v42, %v982_v43  ;;  %v3918_v45 = vpack.c.bf16 %v983_v42, %v982_v43 }
 0x2ea   :  { %4177 = vrot.lane.b32.xlu1 %v4166_v39, %s4303_s19  ;;  %4172 = vrot.lane.b32.xlu0 %v4171_v44, %s4302_s18 }
 0x2eb   :  { %3919 = vmatprep.subr.bf16.mxu0 %v3918_v45 }
 0x2ec   :  { %3921 = vmatpush3.bf16.msra.mxu0 %v3918_v45  ;;  %v3170_v45 = vld [vmem:[%s5126_s9 + $0x18] sm:$0xff] }
 0x2ee   :  { %1266 = vperm.xlu1 %4125, %v1262_v46   ;;  %4182 = vrot.lane.b32.xlu0 %v4171_v44, %s4303_s19  ;;  %v1795_v46 = vld [vmem:[%s5127_s10 + $0x8] sm:$0xff] }
 0x2ef   :  { %3609 = vmatmul.mubr.msk.f32.vlgmr.msra.gmra.mrb[8].mxu0 %vm1013_vm7, %v3143_v47  ;;  %v1794_v47 = vld [vmem:[%s5127_s10] sm:$0xff] }
 0x2f0   :  { %3619 = vmatprep.mubr.msk.f32.mxu0 %vm1013_vm7, %v1008_v48  ;;  %v1530_v48 = vld [vmem:[%s5126_s9] sm:$0xff] }
 0x2f2   :  { %1271 = vperm.xlu0 %4124, %v1263_v49  }
 0x358   :  { %v4168_v50 = vpop.permute.xlu1 %4167 }
 0x359   :  { %v4170_v51 = vunpack.i.h.bf16 %v4168_v50  ;;  %v4169_v52 = vunpack.i.l.bf16 %v4168_v50 }
 0x35b   :  { %v3922_v53 = vpack.c.bf16 %v4170_v51, %v4169_v52  ;;  %v1531_v52 = vld [vmem:[%s5126_s9 + $0x8] sm:$0xff] }
 0x35c   :  { %v4178_v54 = vpop.permute.xlu1 %4177  ;;  %v4173_v55 = vpop.permute.xlu0 %4172 }
 0x35d   :  { %v4180_v56 = vunpack.i.h.bf16 %v4178_v54  ;;  %v4179_v57 = vunpack.i.l.bf16 %v4178_v54  ;;  %v4175_v58 = vunpack.i.h.bf16 %v4173_v55  ;;  %v4174_v59 = vunpack.i.l.bf16 %v4173_v55  ;;  %3924 = vmatprep.subr.msk.bf16.mxu0 %vm4483_vm3, %v3922_v53 }
 0x35e   :  { %3927 = vmatpush3.bf16.msk.msra.mxu0 %vm4483_vm3, %v3922_v53  ;;  %v3177_v53 = vld [vmem:[%s5126_s9 + $0x20] sm:$0xff] }
 0x35f   :  { %v3928_v60 = vpack.c.bf16 %v4175_v58, %v4174_v59  ;;  %v3934_v62 = vpack.c.bf16 %v4180_v56, %v4179_v57 }
 0x360   :  { %v4183_v61 = vpop.permute.xlu0 %4182 }
 0x361   :  { %v4185_v63 = vunpack.i.h.bf16 %v4183_v61  ;;  %v4184_v0 = vunpack.i.l.bf16 %v4183_v61  ;;  %3930 = vmatprep.subr.msk.bf16.mxu0 %vm4483_vm3, %v3928_v60 }
 0x362   :  { %3933 = vmatpush3.bf16.msk.msra.mxu0 %vm4483_vm3, %v3928_v60 }
 0x363   :  { %3936 = vmatprep.subr.msk.bf16.mxu0 %vm4504_vm5, %v3934_v62  ;;  %v3940_v3 = vpack.c.bf16 %v4185_v63, %v4184_v0 }
 0x365   :  { %3620 = vmatmul.mubr.msk.f32.vlgmr.msra.gmra.mrb[8].mxu0 %vm1013_vm7, %v1009_v1  ;;  %v2132_v1 = vld [vmem:[%s5129_s12 + $0x8] sm:$0xff] }
 0x366   :  { %3939 = vmatpush3.bf16.msk.msra.mxu0 %vm4504_vm5, %v3934_v62  ;;  %3630 = vmatprep.mubr.msk.f32.mxu0 %vm1013_vm7, %v3152_v2  ;;  %v2131_v2 = vld [vmem:[%s5129_s12] sm:$0xff] }
 0x367   :  { %3942 = vmatprep.subr.msk.bf16.mxu0 %vm4504_vm5, %v3940_v3 }
 0x36a   :  { %3945 = vmatpush3.bf16.msk.msra.mxu0 %vm4504_vm5, %v3940_v3  ;;  %v3183_v3 = vld [vmem:[%s5128_s11 + $0x28] sm:$0xff] }
 0x36b   :  { %3946 = vmatprep.subr.bf16.mxu0 %v4305_v5 }
 0x36d   :  { %3631 = vmatmul.mubr.msk.f32.vlgmr.msra.gmra.mrb[8].mxu0 %vm1013_vm7, %v3153_v4  ;;  %v1267_v9 = vpop.permute.xlu1 %1266  ;;  %v3184_v4 = vld [vmem:[%s5128_s11 + $0x30] sm:$0xff] }
 0x36e   :  { %3637 = vmatprep.mubr.msk.f32.mxu0 %vm4306_vm8, %v4307_v8 }
 0x371   :  { %v1272_v6 = vpop.permute.xlu0 %1271 }
 0x440   :  { %v3632_v7 = vpop.f32.mrb[8].mxu0 }
 0x441   :  { %v1275_v10 = vadd.f32 %v3632_v7, %v1272_v6  ;;  %v1251_v11 = vpop.f32.mrb[9].mxu0  ;;  %v2134_v6 = vld [vmem:[%s5129_s12 + $0x18] sm:$0xff]  ;;  %v2133_v7 = vld [vmem:[%s5129_s12 + $0x10] sm:$0xff] }
 0x442   :  { %v1274_v12 = vadd.f32 %v1267_v9, %v1251_v11  ;;  %v3185_v9 = vld [vmem:[%s5128_s11 + $0x38] sm:$0xff] }
 0x443   :  { %v1277_v13 = vmax.f32 %v1275_v10, 0.0  ;;  %v1822_v10 = vld [vmem:[%s5128_s11] sm:$0xff] }
 0x444   :  { %v1276_v14 = vmax.f32 %v1274_v12, 0.0 }
 0x446   :  { %v3947_v15 = vpack.c.bf16 %v1277_v13, %v1276_v14  ;;  %v4191_v16 = vpack.i.bf16 %v1277_v13, %v1276_v14 }
 0x448   :  { %4192 = vrot.lane.b32.xlu0 %v4191_v16, %s4303_s19  ;;  %4187 = vrot.lane.b32.xlu1 %v4191_v16, %s4302_s18 }
 0x449   :  { %3948 = vmatpush3.bf16.msra.mxu0 %v3947_v15 }
 0x44c   :  { %1519 = vperm.xlu1 %4125, %v1516_v17   ;;  %3638 = vmatmul.mubr.msk.f32.vlgmr.msra.gmra.mrb[10].mxu0 %vm1293_vm9, %v3160_v18 }
 0x44d   :  { %3673 = vmatprep.mubr.msk.f32.mxu0 %vm1293_vm9, %v3182_v37  ;;  %v3209_v37 = vld [vmem:[%s5130_s13 + $0x58] sm:$0xff] }
 0x4ba   :  { %v4193_v19 = vpop.permute.xlu0 %4192  ;;  %v4188_v20 = vpop.permute.xlu1 %4187 }
 0x4bb   :  { %v4190_v21 = vunpack.i.h.bf16 %v4188_v20  ;;  %v4189_v22 = vunpack.i.l.bf16 %v4188_v20  ;;  %v4195_v23 = vunpack.i.h.bf16 %v4193_v19  ;;  %v4194_v24 = vunpack.i.l.bf16 %v4193_v19  ;;  %v1823_v19 = vld [vmem:[%s5128_s11 + $0x8] sm:$0xff]  ;;  %v1824_v20 = vld [vmem:[%s5128_s11 + $0x10] sm:$0xff] }
 0x4bd   :  { %v3950_v25 = vpack.c.bf16 %v4190_v21, %v4189_v22  ;;  %v3954_v28 = vpack.c.bf16 %v4195_v23, %v4194_v24  ;;  %v1825_v21 = vld [vmem:[%s5128_s11 + $0x18] sm:$0xff]  ;;  %v3196_v22 = vld [vmem:[%s5128_s11 + $0x40] sm:$0xff]  ;;  %v3197_v23 = vld [vmem:[%s5128_s11 + $0x48] sm:$0xff] }
 0x4be   :  { %v3198_v24 = vld [vmem:[%s5128_s11 + $0x50] sm:$0xff] }
 0x4bf   :  { %3952 = vmatpush3.bf16.msk.msra.mxu1 %vm4483_vm3, %v3950_v25  ;;  %v3199_v25 = vld [vmem:[%s5128_s11 + $0x58] sm:$0xff] }
 0x4c0   :  { %3953 = vmatprep.subr.bf16.mxu1 %v4305_v5 }
 0x4c2   :  { %3645 = vmatmul.mubr.msk.f32.vlgmr.msra.gmra.mrb[4].mxu1 %vm1293_vm9, %v1290_v27  ;;  %v3206_v27 = vld [vmem:[%s5130_s13 + $0x40] sm:$0xff] }
 0x4c3   :  { %3956 = vmatpush3.bf16.msk.msra.mxu1 %vm4504_vm5, %v3954_v28  ;;  %3651 = vmatprep.mubr.msk.f32.mxu1 %vm4306_vm8, %v4307_v8 }
 0x4c6   :  { %3652 = vmatmul.mubr.msk.f32.vlgmr.msra.gmra.mrb[6].mxu1 %vm1293_vm9, %v3165_v29 }
 0x4c7   :  { %3656 = vmatprep.mubr.msk.f32.mxu1 %vm1535_vm10, %v3169_v33 }
 0x4cb   :  { %v1520_v42 = vpop.permute.xlu1 %1519 }
 0x51f   :  { %v1363_v30 = vpop.f32.mrb[10].mxu0 }
 0x520   :  { %v3639_v32 = vpop.f32.mrb[11].mxu0 }
 0x595   :  { %v1436_v34 = vpop.f32.mrb[4].mxu1 }
 0x596   :  { %v1437_v35 = vadd.f32 %v1436_v34, %v1363_v30  ;;  %v3646_v36 = vpop.f32.mrb[5].mxu1 }
 0x599   :  { %v1511_v38 = vpop.f32.mrb[6].mxu1 }
 0x59a   :  { %v1515_v39 = vadd.f32 %v1511_v38, %v1437_v35  ;;  %v3653_v40 = vpop.f32.mrb[7].mxu1 }
 0x59c   :  { %v1522_v43 = vadd.f32 %v1520_v42, %v1515_v39 }
 0x59e   :  { %v1523_v44 = vmax.f32 %v1522_v43, 0.0 }
 0x5a0   :  { %1527 = vrot.lane.b32.xlu1 %v1523_v44, %s4303_s19  ;;  %1524 = vrot.lane.b32.xlu0 %v1523_v44, %s4302_s18 }
 0x5a1   :  { %3654 = vmatprep.subr.msk.mxu1 %vm1542_vm11, %v1523_v44 }
 0x5a2   :  { %3655 = vmatpush3.msk.msra.mxu1 %vm1542_vm11, %v1523_v44 }
 0x5a3   :  { %3657 = vmatmul.mubr.msk.f32.vlgmr.msra.gmra.mrb[8].mxu1 %vm1535_vm10, %v3170_v45 }
 0x5a4   :  { %1803 = vperm.xlu1 %4125, %v1795_v46   ;;  %1798 = vperm.xlu0 %4124, %v1794_v47  }
 0x5a5   :  { %3661 = vmatprep.mubr.msk.f32.mxu1 %vm1535_vm10, %v1530_v48 }
 0x612   :  { %v1528_v49 = vpop.permute.xlu1 %1527  ;;  %v1525_v50 = vpop.permute.xlu0 %1524 }
 0x613   :  { %v1526_v51 = vsel %vm4476_vm2, %v1525_v50, 0.0  ;;  %v1529_v54 = vsel %vm4491_vm4, %v1528_v49, 0.0 }
 0x614   :  { %3659 = vmatprep.subr.msk.mxu1 %vm1542_vm11, %v1526_v51 }
 0x615   :  { %3660 = vmatpush3.msk.msra.mxu1 %vm1542_vm11, %v1526_v51  ;;  %v2608_v51 = vld [vmem:[%s5131_s14] sm:$0xff] }
 0x616   :  { %3662 = vmatmul.mubr.msk.f32.vlgmr.msra.gmra.mrb[8].mxu1 %vm1535_vm10, %v1531_v52  ;;  %3664 = vmatprep.subr.msk.mxu1 %vm1542_vm11, %v1529_v54  ;;  %v3207_v52 = vld [vmem:[%s5130_s13 + $0x48] sm:$0xff] }
 0x617   :  { %3665 = vmatpush3.msk.msra.mxu1 %vm1542_vm11, %v1529_v54  ;;  %3666 = vmatprep.mubr.msk.f32.mxu1 %vm1535_vm10, %v3177_v53  ;;  %v3208_v53 = vld [vmem:[%s5130_s13 + $0x50] sm:$0xff] }
 0x618   :  { %v2610_v54 = vld [vmem:[%s5131_s14 + $0x10] sm:$0xff] }
 0x61e   :  { %3667 = vmatmul.mubr.msk.f32.vlgmr.msra.gmra.mrb[8].mxu1 %vm1535_vm10, %v3178_v26  ;;  %v2609_v26 = vld [vmem:[%s5131_s14 + $0x8] sm:$0xff] }
 0x61f   :  { %3707 = vmatprep.mubr.msk.f32.mxu1 %vm1013_vm7, %v3206_v27  ;;  %v3234_v27 = vld [vmem:[%s5130_s13 + $0x80] sm:$0xff] }
 0x623   :  { %v1804_v55 = vpop.permute.xlu1 %1803  ;;  %v1799_v57 = vpop.permute.xlu0 %1798 }
 0x6f1   :  { %v3668_v56 = vpop.f32.mrb[8].mxu1 }
 0x6f2   :  { %v1807_v58 = vadd.f32 %v3668_v56, %v1804_v55  ;;  %v1783_v59 = vpop.f32.mrb[9].mxu1  ;;  %v3210_v55 = vld [vmem:[%s5130_s13 + $0x60] sm:$0xff] }
 0x6f3   :  { %v1806_v60 = vadd.f32 %v1799_v57, %v1783_v59  ;;  %v2612_v56 = vld [vmem:[%s5131_s14 + $0x20] sm:$0xff]  ;;  %v2611_v57 = vld [vmem:[%s5131_s14 + $0x18] sm:$0xff]  ;;  %v3212_v59 = vld [vmem:[%s5130_s13 + $0x70] sm:$0xff] }
 0x6f4   :  { %v1809_v61 = vmax.f32 %v1807_v58, 0.0  ;;  %v3211_v58 = vld [vmem:[%s5130_s13 + $0x68] sm:$0xff] }
 0x6f5   :  { %v1808_v62 = vmax.f32 %v1806_v60, 0.0  ;;  %v2614_v60 = vld [vmem:[%s5131_s14 + $0x30] sm:$0xff] }
 0x6f7   :  { %v4201_v63 = vpack.i.bf16 %v1809_v61, %v1808_v62  ;;  %v3957_v0 = vpack.c.bf16 %v1809_v61, %v1808_v62  ;;  %v2613_v61 = vld [vmem:[%s5131_s14 + $0x28] sm:$0xff]  ;;  %v3213_v62 = vld [vmem:[%s5130_s13 + $0x78] sm:$0xff] }
 0x6f9   :  { %4202 = vrot.lane.b32.xlu1 %v4201_v63, %s4303_s19  ;;  %4197 = vrot.lane.b32.xlu0 %v4201_v63, %s4302_s18  ;;  %v2187_v63 = vld [vmem:[%s5130_s13] sm:$0xff] }
 0x6fa   :  { %3958 = vmatprep.subr.bf16.mxu0 %v3957_v0 }
 0x6fb   :  { %3960 = vmatpush3.bf16.msra.mxu0 %v3957_v0  ;;  %v2615_v0 = vld [vmem:[%s5131_s14 + $0x38] sm:$0xff] }
 0x6fd   :  { %2142 = vperm.xlu1 %4125, %v2132_v1   ;;  %2137 = vperm.xlu0 %4124, %v2131_v2  }
 0x6fe   :  { %3674 = vmatmul.mubr.msk.f32.vlgmr.msra.gmra.mrb[12].mxu0 %vm1293_vm9, %v3183_v3 }
 0x6ff   :  { %3676 = vmatprep.mubr.msk.f32.mxu0 %vm1293_vm9, %v3184_v4 }
 0x701   :  { %2152 = vperm.xlu1 %4125, %v2134_v6   ;;  %2147 = vperm.xlu0 %4124, %v2133_v7  }
 0x702   :  { %3677 = vmatmul.mubr.msk.f32.gmra.mrb[14].mxu0 %vm1293_vm9, %v3185_v9 }
 0x703   :  { %3683 = vmatprep.mubr.msk.f32.mxu0 %vm1293_vm9, %v1822_v10 }
 0x76b   :  { %v4203_v11 = vpop.permute.xlu1 %4202  ;;  %v4198_v12 = vpop.permute.xlu0 %4197 }
 0x76c   :  { %v4205_v13 = vunpack.i.h.bf16 %v4203_v11  ;;  %v4204_v14 = vunpack.i.l.bf16 %v4203_v11  ;;  %v4200_v15 = vunpack.i.h.bf16 %v4198_v12  ;;  %v4199_v16 = vunpack.i.l.bf16 %v4198_v12 }
 0x76e   :  { %v3961_v17 = vpack.c.bf16 %v4200_v15, %v4199_v16  ;;  %v3967_v18 = vpack.c.bf16 %v4205_v13, %v4204_v14 }
 0x770   :  { %3963 = vmatprep.subr.msk.bf16.mxu0 %vm4483_vm3, %v3961_v17 }
 0x771   :  { %3966 = vmatpush3.bf16.msk.msra.mxu0 %vm4483_vm3, %v3961_v17 }
 0x772   :  { %3969 = vmatprep.subr.msk.bf16.mxu0 %vm4504_vm5, %v3967_v18 }
 0x774   :  { %3684 = vmatmul.mubr.msk.f32.vlgmr.msra.gmra.mrb[12].mxu0 %vm1293_vm9, %v1823_v19  ;;  %v2189_v19 = vld [vmem:[%s5130_s13 + $0x10] sm:$0xff] }
 0x775   :  { %3972 = vmatpush3.bf16.msk.msra.mxu0 %vm4504_vm5, %v3967_v18  ;;  %3686 = vmatprep.mubr.msk.f32.mxu0 %vm1293_vm9, %v1824_v20  ;;  %v2188_v18 = vld [vmem:[%s5130_s13 + $0x8] sm:$0xff] }
 0x776   :  { %4005 = vmatprep.subr.bf16.mxu0 %v4305_v5 }
 0x778   :  { %3687 = vmatmul.mubr.msk.f32.gmra.mrb[14].mxu0 %vm1293_vm9, %v1825_v21  ;;  %v2190_v21 = vld [vmem:[%s5130_s13 + $0x18] sm:$0xff] }
 0x779   :  { %3693 = vmatprep.mubr.msk.f32.mxu0 %vm1293_vm9, %v3196_v22  ;;  %v2191_v22 = vld [vmem:[%s5130_s13 + $0x20] sm:$0xff] }
 0x77c   :  { %3694 = vmatmul.mubr.msk.f32.vlgmr.msra.gmra.mrb[12].mxu0 %vm1293_vm9, %v3197_v23  ;;  %v2143_v28 = vpop.permute.xlu1 %2142  ;;  %v2138_v29 = vpop.permute.xlu0 %2137  ;;  %v2192_v23 = vld [vmem:[%s5130_s13 + $0x28] sm:$0xff] }
 0x77d   :  { %3696 = vmatprep.mubr.msk.f32.mxu0 %vm1293_vm9, %v3198_v24  ;;  %v2193_v24 = vld [vmem:[%s5130_s13 + $0x30] sm:$0xff] }
 0x780   :  { %3697 = vmatmul.mubr.msk.f32.gmra.mrb[14].mxu0 %vm1293_vm9, %v3199_v25  ;;  %v2153_v36 = vpop.permute.xlu1 %2152  ;;  %v2148_v40 = vpop.permute.xlu0 %2147  ;;  %v2194_v25 = vld [vmem:[%s5130_s13 + $0x38] sm:$0xff] }
 0x781   :  { %3775 = vmatprep.mubr.msk.f32.mxu0 %vm4306_vm8, %v4307_v8 }
 0x84f   :  { %v3695_v30 = vpop.f32.mrb[12].mxu0 }
 0x850   :  { %v2156_v32 = vadd.f32 %v3695_v30, %v2143_v28  ;;  %v2108_v33 = vpop.f32.mrb[13].mxu0  ;;  %v3235_v28 = vld [vmem:[%s5130_s13 + $0x88] sm:$0xff]  ;;  %v3237_v30 = vld [vmem:[%s5130_s13 + $0x98] sm:$0xff] }
 0x851   :  { %v2155_v34 = vadd.f32 %v2138_v29, %v2108_v33  ;;  %v3236_v29 = vld [vmem:[%s5130_s13 + $0x90] sm:$0xff]  ;;  %v3239_v33 = vld [vmem:[%s5130_s13 + $0xa8] sm:$0xff] }
 0x852   :  { %v2160_v35 = vmax.f32 %v2156_v32, 0.0  ;;  %v3238_v32 = vld [vmem:[%s5130_s13 + $0xa0] sm:$0xff] }
 0x853   :  { %v2159_v38 = vmax.f32 %v2155_v34, 0.0  ;;  %v3698_v39 = vpop.f32.mrb[14].mxu0  ;;  %v3240_v34 = vld [vmem:[%s5130_s13 + $0xb0] sm:$0xff] }
 0x854   :  { %v2158_v42 = vadd.f32 %v3698_v39, %v2153_v36  ;;  %v2118_v43 = vpop.f32.mrb[15].mxu0 }
 0x855   :  { %v2157_v44 = vadd.f32 %v2148_v40, %v2118_v43  ;;  %v4206_v45 = vpack.i.bf16 %v2160_v35, %v2159_v38  ;;  %v3973_v46 = vpack.c.bf16 %v2160_v35, %v2159_v38  ;;  %v3241_v35 = vld [vmem:[%s5130_s13 + $0xb8] sm:$0xff] }
 0x856   :  { %v2162_v47 = vmax.f32 %v2158_v42, 0.0 }
 0x857   :  { %v2161_v48 = vmax.f32 %v2157_v44, 0.0  ;;  %4207 = vrot.lane.b32.xlu0 %v4206_v45, %s4302_s18  ;;  %3974 = vmatprep.subr.bf16.mxu1 %v3973_v46 }
 0x858   :  { %3976 = vmatpush3.bf16.msra.mxu1 %v3973_v46 }
 0x859   :  { %v4211_v49 = vpack.i.bf16 %v2162_v47, %v2161_v48  ;;  %v3977_v50 = vpack.c.bf16 %v2162_v47, %v2161_v48 }
 0x85b   :  { %4217 = vrot.lane.b32.xlu0 %v4206_v45, %s4303_s19  ;;  %4212 = vrot.lane.b32.xlu1 %v4211_v49, %s4302_s18 }
 0x85c   :  { %3978 = vmatprep.subr.bf16.mxu1 %v3977_v50 }
 0x85d   :  { %3980 = vmatpush3.bf16.msra.mxu1 %v3977_v50 }
 0x85f   :  { %2618 = vperm.xlu0 %4124, %v2608_v51   ;;  %4222 = vrot.lane.b32.xlu1 %v4211_v49, %s4303_s19 }
 0x860   :  { %3708 = vmatmul.mubr.msk.f32.vlgmr.msra.gmra.mrb[10].mxu1 %vm1013_vm7, %v3207_v52 }
 0x861   :  { %3710 = vmatprep.mubr.msk.f32.mxu1 %vm1013_vm7, %v3208_v53 }
 0x863   :  { %2628 = vperm.xlu0 %4124, %v2610_v54   ;;  %2623 = vperm.xlu1 %4125, %v2609_v26  }
 0x864   :  { %3711 = vmatmul.mubr.msk.f32.gmra.mrb[12].mxu1 %vm1013_vm7, %v3209_v37 }
 0x865   :  { %3713 = vmatprep.mubr.msk.f32.mxu1 %vm1013_vm7, %v3210_v55 }
 0x867   :  { %2638 = vperm.xlu0 %4124, %v2612_v56   ;;  %2633 = vperm.xlu1 %4125, %v2611_v57  }
 0x868   :  { %3714 = vmatmul.mubr.msk.f32.gmra.mrb[14].mxu1 %vm1013_vm7, %v3211_v58 }
 0x869   :  { %3716 = vmatprep.mubr.msk.f32.mxu1 %vm1013_vm7, %v3212_v59 }
 0x86b   :  { %2648 = vperm.xlu0 %4124, %v2614_v60   ;;  %2643 = vperm.xlu1 %4125, %v2613_v61  }
 0x86c   :  { %3717 = vmatmul.mubr.msk.f32.gmra.mrb[16].mxu1 %vm1013_vm7, %v3213_v62 }
 0x86d   :  { %3727 = vmatprep.mubr.msk.f32.mxu1 %vm1013_vm7, %v2187_v63 }
 0x86f   :  { %2653 = vperm.xlu1 %4125, %v2615_v0  }
 0x8c9   :  { %v4208_v1 = vpop.permute.xlu0 %4207 }
 0x8ca   :  { %v4210_v2 = vunpack.i.h.bf16 %v4208_v1  ;;  %v4209_v3 = vunpack.i.l.bf16 %v4208_v1 }
 0x8cc   :  { %v3981_v4 = vpack.c.bf16 %v4210_v2, %v4209_v3 }
 0x8cd   :  { %v4218_v6 = vpop.permute.xlu0 %4217  ;;  %v4213_v7 = vpop.permute.xlu1 %4212 }
 0x8ce   :  { %v4220_v9 = vunpack.i.h.bf16 %v4218_v6  ;;  %v4219_v10 = vunpack.i.l.bf16 %v4218_v6  ;;  %v4215_v11 = vunpack.i.h.bf16 %v4213_v7  ;;  %v4214_v12 = vunpack.i.l.bf16 %v4213_v7  ;;  %3983 = vmatprep.subr.msk.bf16.mxu1 %vm4483_vm3, %v3981_v4 }
 0x8cf   :  { %3986 = vmatpush3.bf16.msk.msra.mxu1 %vm4483_vm3, %v3981_v4 }
 0x8d0   :  { %v3987_v13 = vpack.c.bf16 %v4215_v11, %v4214_v12  ;;  %v3993_v15 = vpack.c.bf16 %v4220_v9, %v4219_v10 }
 0x8d1   :  { %v4223_v14 = vpop.permute.xlu1 %4222 }
 0x8d2   :  { %v4225_v16 = vunpack.i.h.bf16 %v4223_v14  ;;  %v4224_v17 = vunpack.i.l.bf16 %v4223_v14  ;;  %3989 = vmatprep.subr.msk.bf16.mxu1 %vm4483_vm3, %v3987_v13  ;;  %v3002_v14 = vld [vmem:[%s5133_s16 + $0x8] sm:$0xff] }
 0x8d3   :  { %3992 = vmatpush3.bf16.msk.msra.mxu1 %vm4483_vm3, %v3987_v13 }
 0x8d4   :  { %3995 = vmatprep.subr.msk.bf16.mxu1 %vm4504_vm5, %v3993_v15  ;;  %v3999_v20 = vpack.c.bf16 %v4225_v16, %v4224_v17  ;;  %v3254_v16 = vld [vmem:[%s5132_s15 + $0x18] sm:$0xff]  ;;  %v3003_v17 = vld [vmem:[%s5133_s16 + $0x10] sm:$0x7] }
 0x8d6   :  { %3728 = vmatmul.mubr.msk.f32.vlgmr.msra.gmra.mrb[10].mxu1 %vm1013_vm7, %v2188_v18  ;;  %v3255_v18 = vld [vmem:[%s5132_s15 + $0x20] sm:$0xff] }
 0x8d7   :  { %3998 = vmatpush3.bf16.msk.msra.mxu1 %vm4504_vm5, %v3993_v15  ;;  %3730 = vmatprep.mubr.msk.f32.mxu1 %vm1013_vm7, %v2189_v19  ;;  %v3001_v15 = vld [vmem:[%s5133_s16] sm:$0xff]  ;;  %v3256_v19 = vld [vmem:[%s5132_s15 + $0x28] sm:$0x7] }
 0x8d8   :  { %4001 = vmatprep.subr.msk.bf16.mxu1 %vm4504_vm5, %v3999_v20 }
 0x8da   :  { %3731 = vmatmul.mubr.msk.f32.gmra.mrb[12].mxu1 %vm1013_vm7, %v2190_v21 }
 0x8db   :  { %4004 = vmatpush3.bf16.msk.msra.mxu1 %vm4504_vm5, %v3999_v20  ;;  %3733 = vmatprep.mubr.msk.f32.mxu1 %vm1013_vm7, %v2191_v22 }
 0x8dc   :  { %4033 = vmatprep.subr.bf16.mxu1 %v4305_v5 }
 0x8de   :  { %3734 = vmatmul.mubr.msk.f32.gmra.mrb[14].mxu1 %vm1013_vm7, %v2192_v23  ;;  %v2619_v38 = vpop.permute.xlu0 %2618 }
 0x8df   :  { %3736 = vmatprep.mubr.msk.f32.mxu1 %vm1013_vm7, %v2193_v24 }
 0x8e2   :  { %3737 = vmatmul.mubr.msk.f32.gmra.mrb[16].mxu1 %vm1013_vm7, %v2194_v25  ;;  %v2624_v36 = vpop.permute.xlu1 %2623  ;;  %v2629_v42 = vpop.permute.xlu0 %2628 }
 0x8e3   :  { %3747 = vmatprep.mubr.msk.f32.mxu1 %vm1013_vm7, %v3234_v27 }
 0x8e6   :  { %3748 = vmatmul.mubr.msk.f32.vlgmr.msra.gmra.mrb[10].mxu1 %vm1013_vm7, %v3235_v28  ;;  %v2634_v39 = vpop.permute.xlu1 %2633  ;;  %v2639_v26 = vpop.permute.xlu0 %2638 }
 0x8e7   :  { %3750 = vmatprep.mubr.msk.f32.mxu1 %vm1013_vm7, %v3236_v29 }
 0x8ea   :  { %3751 = vmatmul.mubr.msk.f32.gmra.mrb[12].mxu1 %vm1013_vm7, %v3237_v30  ;;  %v2644_v51 = vpop.permute.xlu1 %2643  ;;  %v2649_v2 = vpop.permute.xlu0 %2648 }
 0x8eb   :  { %3753 = vmatprep.mubr.msk.f32.mxu1 %vm1013_vm7, %v3238_v32 }
 0x8ee   :  { %3754 = vmatmul.mubr.msk.f32.gmra.mrb[14].mxu1 %vm1013_vm7, %v3239_v33  ;;  %v2654_v63 = vpop.permute.xlu1 %2653 }
 0x8ef   :  { %3756 = vmatprep.mubr.msk.f32.mxu1 %vm1013_vm7, %v3240_v34 }
 0x8f2   :  { %3757 = vmatmul.mubr.msk.f32.gmra.mrb[16].mxu1 %vm1013_vm7, %v3241_v35 }
 0x8f3   :  { %3825 = vmatprep.mubr.msk.f32.mxu1 %vm4306_vm8, %v4307_v8 }
 0x9b9   :  { %v3749_v40 = vpop.f32.mrb[10].mxu1 }
 0x9ba   :  { %v2657_v43 = vadd.f32 %v3749_v40, %v2624_v36  ;;  %v2561_v44 = vpop.f32.mrb[11].mxu1 }
 0x9bb   :  { %v2656_v45 = vadd.f32 %v2619_v38, %v2561_v44 }
 0x9bc   :  { %v2665_v46 = vmax.f32 %v2657_v43, 0.0 }
 0x9bd   :  { %v2664_v47 = vmax.f32 %v2656_v45, 0.0  ;;  %v3752_v48 = vpop.f32.mrb[12].mxu1 }
 0x9be   :  { %v2659_v49 = vadd.f32 %v3752_v48, %v2634_v39  ;;  %v2571_v50 = vpop.f32.mrb[13].mxu1 }
 0x9bf   :  { %v4006_v52 = vpack.c.bf16 %v2665_v46, %v2664_v47  ;;  %v2658_v53 = vadd.f32 %v2629_v42, %v2571_v50  ;;  %v4231_v54 = vpack.i.bf16 %v2665_v46, %v2664_v47 }
 0x9c0   :  { %v2667_v37 = vmax.f32 %v2659_v49, 0.0 }
 0x9c1   :  { %v2666_v55 = vmax.f32 %v2658_v53, 0.0  ;;  %4232 = vrot.lane.b32.xlu1 %v4231_v54, %s4303_s19  ;;  %4227 = vrot.lane.b32.xlu0 %v4231_v54, %s4302_s18  ;;  %v3755_v56 = vpop.f32.mrb[14].mxu1 }
 0x9c2   :  { %v2661_v57 = vadd.f32 %v3755_v56, %v2644_v51  ;;  %4007 = vmatpush3.bf16.msra.mxu0 %v4006_v52  ;;  %v2581_v58 = vpop.f32.mrb[15].mxu1  ;;  %v3273_v56 = vld [vmem:[%s5132_s15 + $0x40] sm:$0x7] }
 0x9c3   :  { %v4009_v59 = vpack.c.bf16 %v2667_v37, %v2666_v55  ;;  %v2660_v60 = vadd.f32 %v2639_v26, %v2581_v58  ;;  %4008 = vmatprep.subr.bf16.mxu0 %v4305_v5  ;;  %v4241_v61 = vpack.i.bf16 %v2667_v37, %v2666_v55  ;;  %v2720_v37 = vld [vmem:[%s5132_s15] sm:$0xff]  ;;  %v3271_v55 = vld [vmem:[%s5132_s15 + $0x30] sm:$0xff] }
 0x9c4   :  { %v2669_v62 = vmax.f32 %v2661_v57, 0.0 }
 0x9c5   :  { %v2668_v0 = vmax.f32 %v2660_v60, 0.0  ;;  %4242 = vrot.lane.b32.xlu1 %v4241_v61, %s4303_s19  ;;  %4237 = vrot.lane.b32.xlu0 %v4241_v61, %s4302_s18  ;;  %v3758_v1 = vpop.f32.mrb[16].mxu1 }
 0x9c6   :  { %v2663_v3 = vadd.f32 %v3758_v1, %v2654_v63  ;;  %4010 = vmatpush3.bf16.msra.mxu0 %v4009_v59  ;;  %v2591_v4 = vpop.f32.mrb[17].mxu1 }
 0x9c7   :  { %v4012_v6 = vpack.c.bf16 %v2669_v62, %v2668_v0  ;;  %v2662_v7 = vadd.f32 %v2649_v2, %v2591_v4  ;;  %4011 = vmatprep.subr.bf16.mxu0 %v4305_v5  ;;  %v4251_v9 = vpack.i.bf16 %v2669_v62, %v2668_v0 }
 0x9c8   :  { %v2671_v10 = vmax.f32 %v2663_v3, 0.0 }
 0x9c9   :  { %v2670_v11 = vmax.f32 %v2662_v7, 0.0  ;;  %4252 = vrot.lane.b32.xlu1 %v4251_v9, %s4303_s19  ;;  %4247 = vrot.lane.b32.xlu0 %v4251_v9, %s4302_s18 }
 0x9ca   :  { %4013 = vmatpush3.bf16.msra.mxu0 %v4012_v6 }
 0x9cb   :  { %v4015_v12 = vpack.c.bf16 %v2671_v10, %v2670_v11  ;;  %4014 = vmatprep.subr.bf16.mxu0 %v4305_v5  ;;  %v4261_v13 = vpack.i.bf16 %v2671_v10, %v2670_v11 }
 0x9cd   :  { %4262 = vrot.lane.b32.xlu1 %v4261_v13, %s4303_s19  ;;  %4257 = vrot.lane.b32.xlu0 %v4261_v13, %s4302_s18 }
 0x9ce   :  { %4016 = vmatpush3.bf16.msra.mxu0 %v4015_v12 }
 0x9cf   :  { %4017 = vmatprep.subr.bf16.mxu0 %v4305_v5 }
 0x9d1   :  { %3011 = vperm.xlu1 %4125, %v3002_v14   ;;  %3006 = vperm.xlu0 %4124, %v3001_v15  }
 0x9d2   :  { %3776 = vmatmul.mubr.msk.f32.vlgmr.msra.gmra.mrb[16].mxu0 %vm651_vm6, %v3254_v16 }
 0x9d3   :  { %3778 = vmatprep.mubr.msk.f32.mxu0 %vm4306_vm8, %v4307_v8 }
 0x9d5   :  { %3016 = vperm.xlu0 %4124, %v3003_v17  }
 0x9d6   :  { %3779 = vmatmul.mubr.msk.f32.gmra.mrb[18].mxu0 %vm651_vm6, %v3255_v18 }
 0x9d7   :  { %3781 = vmatprep.mubr.msk.f32.mxu0 %vm4306_vm8, %v4307_v8 }
 0x9da   :  { %3782 = vmatmul.mubr.msk.f32.gmra.mrb[20].mxu0 %vm651_vm6, %v3256_v19 }
 0x9db   :  { %3800 = vmatprep.mubr.msk.f32.mxu0 %vm4306_vm8, %v4307_v8 }
 0xa33   :  { %v4233_v20 = vpop.permute.xlu1 %4232  ;;  %v4228_v21 = vpop.permute.xlu0 %4227 }
 0xa34   :  { %v4235_v22 = vunpack.i.h.bf16 %v4233_v20  ;;  %v4234_v23 = vunpack.i.l.bf16 %v4233_v20  ;;  %v4230_v24 = vunpack.i.h.bf16 %v4228_v21  ;;  %v4229_v25 = vunpack.i.l.bf16 %v4228_v21 }
 0xa36   :  { %v4034_v27 = vpack.c.bf16 %v4235_v22, %v4234_v23  ;;  %v4018_v28 = vpack.c.bf16 %v4230_v24, %v4229_v25 }
 0xa37   :  { %v4243_v29 = vpop.permute.xlu1 %4242  ;;  %v4238_v30 = vpop.permute.xlu0 %4237 }
 0xa38   :  { %v4245_v32 = vunpack.i.h.bf16 %v4243_v29  ;;  %v4244_v33 = vunpack.i.l.bf16 %v4243_v29  ;;  %v4240_v34 = vunpack.i.h.bf16 %v4238_v30  ;;  %v4239_v35 = vunpack.i.l.bf16 %v4238_v30  ;;  %4020 = vmatpush3.bf16.msk.msra.mxu0 %vm4483_vm3, %v4018_v28  ;;  %4036 = vmatpush3.bf16.msk.msra.mxu1 %vm4504_vm5, %v4034_v27 }
 0xa39   :  { %4037 = vmatprep.subr.bf16.mxu1 %v4305_v5  ;;  %4021 = vmatprep.subr.bf16.mxu0 %v4305_v5 }
 0xa3a   :  { %v4038_v36 = vpack.c.bf16 %v4245_v32, %v4244_v33  ;;  %v4022_v38 = vpack.c.bf16 %v4240_v34, %v4239_v35 }
 0xa3b   :  { %v4253_v39 = vpop.permute.xlu1 %4252  ;;  %v4248_v40 = vpop.permute.xlu0 %4247 }
 0xa3c   :  { %v4255_v42 = vunpack.i.h.bf16 %v4253_v39  ;;  %v4254_v43 = vunpack.i.l.bf16 %v4253_v39  ;;  %v4250_v44 = vunpack.i.h.bf16 %v4248_v40  ;;  %v4249_v45 = vunpack.i.l.bf16 %v4248_v40  ;;  %4024 = vmatpush3.bf16.msk.msra.mxu0 %vm4483_vm3, %v4022_v38  ;;  %4040 = vmatpush3.bf16.msk.msra.mxu1 %vm4504_vm5, %v4038_v36 }
 0xa3d   :  { %4041 = vmatprep.subr.bf16.mxu1 %v4305_v5  ;;  %4025 = vmatprep.subr.bf16.mxu0 %v4305_v5 }
 0xa3e   :  { %v4042_v46 = vpack.c.bf16 %v4255_v42, %v4254_v43  ;;  %v4026_v47 = vpack.c.bf16 %v4250_v44, %v4249_v45 }
 0xa3f   :  { %v4263_v48 = vpop.permute.xlu1 %4262  ;;  %v4258_v49 = vpop.permute.xlu0 %4257 }
 0xa40   :  { %v4265_v50 = vunpack.i.h.bf16 %v4263_v48  ;;  %v4264_v51 = vunpack.i.l.bf16 %v4263_v48  ;;  %v4260_v52 = vunpack.i.h.bf16 %v4258_v49  ;;  %v4259_v53 = vunpack.i.l.bf16 %v4258_v49  ;;  %4028 = vmatpush3.bf16.msk.msra.mxu0 %vm4483_vm3, %v4026_v47  ;;  %4044 = vmatpush3.bf16.msk.msra.mxu1 %vm4504_vm5, %v4042_v46 }
 0xa41   :  { %4029 = vmatprep.subr.bf16.mxu0 %v4305_v5  ;;  %4045 = vmatprep.subr.bf16.mxu1 %v4305_v5  ;;  %v2722_v5 = vld [vmem:[%s5132_s15 + $0x10] sm:$0x7]  ;;  %s4308_s15 = smov [#allocation2]  }
 0xa42   :  { %v4046_v54 = vpack.c.bf16 %v4265_v50, %v4264_v51  ;;  %v4030_v26 = vpack.c.bf16 %v4260_v52, %v4259_v53  ;;  %s3048_s14 = sshll.u32 %s4308_s15, 4  ;;  %s3049_s14 = int_to_ptr.vmem [resolvable:$true] %s3048_s14 }
 0xa43   :  { %s4278_s12 = scalar_lea.vmem %s3049_s14, 384  ;;  %p4283_p1 = scmp.lt.s32.totalorder %s3049_s14, %s3049_s14 }
 0xa44   :  { %4032 = vmatpush3.bf16.msk.msra.mxu0 %vm4483_vm3, %v4030_v26  ;;  %4048 = vmatpush3.bf16.msk.msra.mxu1 %vm4504_vm5, %v4046_v54  ;;  %p4279_p0 = scmp.ne.s32.totalorder %s3049_s14, %s4278_s12  ;;  %p4284_p2 = scmp.lt.s32.totalorder %s4278_s12, %s4278_s12 }
 0xa46   :  { %p4285_p3 = por %p4284_p2, %p4283_p1 }
 0xa47   :  { %3801 = vmatmul.mubr.msk.f32.vlgmr.msra.gmra.mrb[22].mxu0 %vm651_vm6, %v2720_v37  ;;  %3826 = vmatmul.mubr.msk.f32.vlgmr.msra.gmra.mrb[18].mxu1 %vm651_vm6, %v3271_v55 }
 0xa48   :  { %3803 = vmatprep.mubr.msk.f32.mxu0 %vm4306_vm8, %v4307_v8  ;;  %3828 = vmatprep.mubr.msk.f32.mxu1 %vm4306_vm8, %v4307_v8  ;;  %p4286_p4 = pnand %p4285_p3, %p4279_p0 }
 0xa4b   :  { %3804 = vmatmul.mubr.msk.f32.gmra.mrb[24].mxu0 %vm651_vm6, %v2721_v31  ;;  %3829 = vmatmul.mubr.msk.f32.gmra.mrb[20].mxu1 %vm651_vm6, %v3272_v41 }
 0xa4c   :  { %3806 = vmatprep.mubr.msk.f32.mxu0 %vm4306_vm8, %v4307_v8  ;;  %3831 = vmatprep.mubr.msk.f32.mxu1 %vm4306_vm8, %v4307_v8 }
 0xa4f   :  { %3807 = vmatmul.mubr.msk.f32.gmra.mrb[26].mxu0 %vm651_vm6, %v2722_v5  ;;  %3832 = vmatmul.mubr.msk.f32.gmra.mrb[22].mxu1 %vm651_vm6, %v3273_v56 }
 0xa50   :  { %v3007_v8 = vpop.permute.xlu0 %3006  ;;  %v3012_v13 = vpop.permute.xlu1 %3011 }
 0xa54   :  { %v3017_v24 = vpop.permute.xlu0 %3016 }
 0xaa5   :  { %v2802_v57 = vpop.f32.mrb[16].mxu0 }
 0xaa6   :  { %v3777_v58 = vpop.f32.mrb[17].mxu0 }
 0xaa9   :  { %v2807_v59 = vpop.f32.mrb[18].mxu0 }
 0xaaa   :  { %v3780_v60 = vpop.f32.mrb[19].mxu0 }
 0xaad   :  { %v2812_v61 = vpop.f32.mrb[20].mxu0 }
 0xaae   :  { %v3783_v62 = vpop.f32.mrb[21].mxu0 }
 0xb1a   :  { %v2891_v63 = vpop.f32.mrb[22].mxu0  ;;  %v2984_v0 = vpop.f32.mrb[18].mxu1 }
 0xb1b   :  { %v2892_v1 = vadd.f32 %v2891_v63, %v2802_v57  ;;  %v3802_v2 = vpop.f32.mrb[23].mxu0  ;;  %v3827_v3 = vpop.f32.mrb[19].mxu1 }
 0xb1d   :  { %v2998_v4 = vadd.f32 %v2984_v0, %v2892_v1 }
 0xb1e   :  { %v2896_v6 = vpop.f32.mrb[24].mxu0  ;;  %v2989_v7 = vpop.f32.mrb[20].mxu1 }
 0xb1f   :  { %v3019_v9 = vadd.f32 %v3007_v8, %v2998_v4  ;;  %v2897_v10 = vadd.f32 %v2896_v6, %v2807_v59  ;;  %v3805_v11 = vpop.f32.mrb[25].mxu0  ;;  %v3830_v12 = vpop.f32.mrb[21].mxu1 }
 0xb21   :  { %v3285_v14 = vmul.f32 -1.442695, %v3019_v9  ;;  %v2999_v15 = vadd.f32 %v2989_v7, %v2897_v10 }
 0xb22   :  { %v2901_v16 = vpop.f32.mrb[26].mxu0  ;;  %v2994_v17 = vpop.f32.mrb[22].mxu1 }
 0xb23   :  { %4266 = vpow2.f32 %v3285_v14  ;;  %v3020_v18 = vadd.f32 %v3012_v13, %v2999_v15  ;;  %v2902_v19 = vadd.f32 %v2901_v16, %v2812_v61  ;;  %v3808_v20 = vpop.f32.mrb[27].mxu0  ;;  %v3833_v21 = vpop.f32.mrb[23].mxu1 }
 0xb25   :  { %v3286_v22 = vmul.f32 -1.442695, %v3020_v18  ;;  %v3000_v23 = vadd.f32 %v2994_v17, %v2902_v19 }
 0xb27   :  { %4268 = vpow2.f32 %v3286_v22  ;;  %v3021_v25 = vadd.f32 %v3017_v24, %v3000_v23 }
 0xb29   :  { %v3287_v27 = vmul.f32 -1.442695, %v3021_v25 }
 0xb2b   :  { %4270 = vpow2.f32 %v3287_v27 }
 0xb2d   :  { %v4267_v28 = vpop.eup %4266 }
 0xb2e   :  { %v3031_v29 = vadd.f32 1.0, %v4267_v28 }
 0xb30   :  { %4272 = vrcp.f32 %v3031_v29 }
 0xb31   :  { %v4269_v30 = vpop.eup %4268 }
 0xb32   :  { %v3032_v32 = vadd.f32 1.0, %v4269_v30 }
 0xb34   :  { %4274 = vrcp.f32 %v3032_v32 }
 0xb35   :  { %v4271_v33 = vpop.eup %4270 }
 0xb36   :  { %v3033_v34 = vadd.f32 1.0, %v4271_v33 }
 0xb38   :  { %4276 = vrcp.f32 %v3033_v34 }
 0xb3a   :  { %v4273_v35 = vpop.eup %4272 }
 0xb3b   :  { %3040 = vst [vmem:[#allocation2] sm:$0xff] %v4273_v35 }
 0xb3e   :  { %v4275_v36 = vpop.eup %4274 }
 0xb3f   :  { %3041 = vst [vmem:[#allocation2 + $0x8] sm:$0xff] %v4275_v36 }
 0xb42   :  { %v4277_v38 = vpop.eup %4276 }
 0xb43   :  { %3042 = vst [vmem:[#allocation2 + $0x10] sm:$0x7] %v4277_v38 }
 0xb44   :  { %4289 = shalt.err (!%p4286_p4)
}
 0xb45   :  { %s4290_s30 = scalar_lea.hbm %s5134_s17, 384 }
 0xb46   :  { %p4291_p5 = scmp.ne.s32.totalorder %s5134_s17, %s4290_s30  ;;  %p4294_p6 = scmp.lt.u32.totalorder %s4290_s30, %s5134_s17 }
 0xb48   :  { %p4296_p7 = pnand %p4294_p6, %p4291_p5 }
 0xb4a   :  { %4299 = shalt.err (!%p4296_p7)
}
 0xb4b   :  { %s4309_s9 = smov 128   ;;  %s4310_s8 = smov 8  }
 0xb4c   :  { %3054 = dma.vmem_to_hbm [thread:$0]  %s3049_s14, 384, %s5134_s17, [#allocation3], %s4309_s9, %s4309_s9, %s4310_s8  }
 0xb4d   :  { %4300 = dma.done.wait [#allocation3], 384  }
 0xb4e   :  { %4301 = vsyncadd [#allocation3], 4294966912 }
 0xb4f   :  { %3058 = vsyncpa [#allocation3], 1 }

</bundles_post_ra>
